<compile_context>
chip_gen: v7x
topology: tpu7x:2x2x1
jax: 0.10.0
libtpu: 0.0.40
codegen_flags: <defaults>
</compile_context>

<pallas_src>
import jax
import jax.numpy as jnp
from jax.experimental import pallas as pl
from jax.experimental.pallas import tpu as pltpu

INPUT_SIZE = 784
HIDDEN_SIZE = 500
NUM_CLASSES = 10

HID_PAD = 512    # 500 -> 512 (lane aligned)
OUT_PAD = 128    # 10  -> 128 (lane-dense output slab, sliced in the wrapper)
MAX_TB = 1024    # batch tile for large batches (multiple of 256)


def _round_up(n, m):
    return ((n + m - 1) // m) * m


def mlp_kernel(x_ref, w1_ref, b1_ref, w2_ref, b2_ref, w3_ref, b3_ref, o_ref):
    # x: (TB, 784) f32 -> bf16 in-kernel (cheap VPU filler, hidden under MXU).
    x = x_ref[...].astype(jnp.bfloat16)
    # fc1 + relu (f32 accumulate, f32 elementwise)
    h1 = jnp.dot(x, w1_ref[...], preferred_element_type=jnp.float32)
    h1 = jnp.maximum(h1 + b1_ref[...], 0.0)
    # fc2 + relu
    h2 = jnp.dot(h1.astype(jnp.bfloat16), w2_ref[...],
                 preferred_element_type=jnp.float32)
    h2 = jnp.maximum(h2 + b2_ref[...], 0.0)
    # fc3 (no activation)
    h3 = jnp.dot(h2.astype(jnp.bfloat16), w3_ref[...],
                 preferred_element_type=jnp.float32)
    o_ref[...] = (h3 + b3_ref[...]).astype(o_ref.dtype)


def init_params(key):
    """f32 params, PyTorch nn.Linear-style init, stored as (in, out) / (1, out)."""
    def linear(key, fan_in, fan_out):
        kw, kb = jax.random.split(key)
        bound = 1.0 / jnp.sqrt(fan_in)
        w = jax.random.uniform(kw, (fan_in, fan_out), jnp.float32, -bound, bound)
        b = jax.random.uniform(kb, (1, fan_out), jnp.float32, -bound, bound)
        return w, b

    k1, k2, k3 = jax.random.split(key, 3)
    w1, b1 = linear(k1, INPUT_SIZE, HIDDEN_SIZE)
    w2, b2 = linear(k2, HIDDEN_SIZE, HIDDEN_SIZE)
    w3, b3 = linear(k3, HIDDEN_SIZE, NUM_CLASSES)
    return {"w1": w1, "b1": b1, "w2": w2, "b2": b2, "w3": w3, "b3": b3}


def prepare_params(params):
    """Pad / cast weights ONCE at init (hoisted out of the forward pass).

    w1 keeps its 784 input rows (no dead K columns); hidden/output dims pad to
    512 / 128 with zeros, which is mathematically exact: padded hidden units
    get bias 0 -> ReLU 0 -> contribute nothing, padded classes are sliced away.
    Weights are bf16 (native MXU dtype, half the HBM weight traffic); biases f32.
    """
    def pad_cols(a, c):
        return jnp.pad(a, ((0, 0), (0, c - a.shape[1])))

    w1 = pad_cols(params["w1"], HID_PAD).astype(jnp.bfloat16)          # (784, 512)
    b1 = pad_cols(params["b1"], HID_PAD)                               # (1, 512) f32
    w2 = jnp.pad(params["w2"],
                 ((0, HID_PAD - HIDDEN_SIZE),
                  (0, HID_PAD - HIDDEN_SIZE))).astype(jnp.bfloat16)    # (512, 512)
    b2 = pad_cols(params["b2"], HID_PAD)                               # (1, 512) f32
    w3 = jnp.pad(params["w3"],
                 ((0, HID_PAD - HIDDEN_SIZE),
                  (0, OUT_PAD - NUM_CLASSES))).astype(jnp.bfloat16)    # (512, 128)
    b3 = pad_cols(params["b3"], OUT_PAD)                               # (1, 128) f32
    return w1, b1, w2, b2, w3, b3


def _batch_semantics(num_tiles):
    """CORE_PARALLEL shards batch tiles across v7x's two TensorCores; on the
    single-TC v5e/v6e keep plain "parallel" (near-zero codegen effect)."""
    try:
        kind = jax.devices()[0].device_kind.lower()
    except Exception:
        kind = ""
    if num_tiles > 1 and ("v7" in kind or "tpu7" in kind):
        return (pltpu.CORE_PARALLEL,)
    return ("parallel",)


@jax.jit
def neural_net_forward(x, prepared):
    """x: (B, 784) float32. prepared = prepare_params(params). Returns (B, 10) f32 logits."""
    w1, b1, w2, b2, w3, b3 = prepared
    B = x.shape[0]

    # Batch tile: 1024 rows for big batches (multiple of 256 -> clean MXU row
    # passes, ~10% grid-step overhead); otherwise one tile rounded to 128.
    TB = MAX_TB if B >= MAX_TB else _round_up(max(B, 1), 128)
    B_pad = _round_up(B, TB)
    if B_pad != B:
        x = jnp.pad(x, ((0, B_pad - B), (0, 0)))   # batch-dim pad only; fuses under jit
    num_tiles = B_pad // TB

    const = lambda shape: pl.BlockSpec(shape, lambda i: (0, 0))  # VMEM-resident

    out = pl.pallas_call(
        mlp_kernel,
        out_shape=jax.ShapeDtypeStruct((B_pad, OUT_PAD), jnp.float32),
        grid=(num_tiles,),
        in_specs=[
            # 784 == full array dim, so the non-128 last dim is allowed.
            pl.BlockSpec((TB, INPUT_SIZE), lambda i: (i, 0)),
            const(w1.shape), const(b1.shape),
            const(w2.shape), const(b2.shape),
            const(w3.shape), const(b3.shape),
        ],
        out_specs=pl.BlockSpec((TB, OUT_PAD), lambda i: (i, 0)),
        compiler_params=pltpu.CompilerParams(
            dimension_semantics=_batch_semantics(num_tiles),
            vmem_limit_bytes=32 << 20,   # ~14 MiB actually used at TB=1024
        ),
    )(x, w1, b1, w2, b2, w3, b3)

    return out[:B, :NUM_CLASSES]


def reference_forward(x, params):
    """Pure-JAX reference reproducing the kernel's bf16-in / f32-accumulate math."""
    c = lambda a: a.astype(jnp.bfloat16).astype(jnp.float32)
    hi = jax.lax.Precision.HIGHEST
    h1 = jnp.maximum(
        jnp.dot(c(x), c(params["w1"]), precision=hi) + params["b1"], 0.0)
    h2 = jnp.maximum(
        jnp.dot(c(h1), c(params["w2"]), precision=hi) + params["b2"], 0.0)
    return jnp.dot(c(h2), c(params["w3"]), precision=hi) + params["b3"]


if __name__ == "__main__":
    key = jax.random.PRNGKey(0)
    kp, kx = jax.random.split(key)
    params = init_params(kp)
    prepared = prepare_params(params)   # hoisted: pad/cast weights once, not per call

    batch = 8
    x = jax.random.normal(kx, (batch, INPUT_SIZE), jnp.float32)

    out = jax.block_until_ready(neural_net_forward(x, prepared))
    ref = reference_forward(x, params)

    assert out.shape == (batch, NUM_CLASSES)
    assert jnp.allclose(out, ref, atol=1e-3, rtol=1e-3), (
        float(jnp.max(jnp.abs(out - ref))))

    print("KERNEL_OK")
</pallas_src>

<mosaic_0001>
module attributes {stable_mosaic.version = 11 : i64} {
  func.func @mlp_kernel(%arg0: i32, %arg1: memref<128x784xf32, #tpu.memory_space<vmem>>, %arg2: memref<784x512xbf16, #tpu.memory_space<vmem>>, %arg3: memref<1x512xf32, #tpu.memory_space<vmem>>, %arg4: memref<512x512xbf16, #tpu.memory_space<vmem>>, %arg5: memref<1x512xf32, #tpu.memory_space<vmem>>, %arg6: memref<512x128xbf16, #tpu.memory_space<vmem>>, %arg7: memref<1x128xf32, #tpu.memory_space<vmem>>, %arg8: memref<128x128xf32, #tpu.memory_space<vmem>>) attributes {dimension_semantics = [#tpu.dimension_semantics<parallel>], iteration_bounds = array<i64: 1>, scalar_prefetch = 0 : i64, scratch_operands = 0 : i64, tpu.core_type = #tpu.core_type<tc>, window_params = [{transform_indices = @transform_0, window_bounds = array<i64: 128, 784>}, {pipeline_mode = #tpu.pipeline_mode<synchronous>, transform_indices = @transform_1, window_bounds = array<i64: 784, 512>}, {pipeline_mode = #tpu.pipeline_mode<synchronous>, transform_indices = @transform_2, window_bounds = array<i64: 1, 512>}, {pipeline_mode = #tpu.pipeline_mode<synchronous>, transform_indices = @transform_3, window_bounds = array<i64: 512, 512>}, {pipeline_mode = #tpu.pipeline_mode<synchronous>, transform_indices = @transform_4, window_bounds = array<i64: 1, 512>}, {pipeline_mode = #tpu.pipeline_mode<synchronous>, transform_indices = @transform_5, window_bounds = array<i64: 512, 128>}, {pipeline_mode = #tpu.pipeline_mode<synchronous>, transform_indices = @transform_6, window_bounds = array<i64: 1, 128>}, {transform_indices = @transform_7, window_bounds = array<i64: 128, 128>}]} {
    %c0 = arith.constant 0 : index
    %c0_0 = arith.constant 0 : index
    %0 = vector.load %arg1[%c0, %c0_0] : memref<128x784xf32, #tpu.memory_space<vmem>>, vector<128x784xf32>
    %1 = arith.truncf %0 : vector<128x784xf32> to vector<128x784xbf16>
    %c0_1 = arith.constant 0 : index
    %c0_2 = arith.constant 0 : index
    %2 = vector.load %arg2[%c0_1, %c0_2] : memref<784x512xbf16, #tpu.memory_space<vmem>>, vector<784x512xbf16>
    %cst = arith.constant dense<0.000000e+00> : vector<128x512xf32>
    %3 = tpu.matmul %1, %2, %cst {dimension_numbers = #tpu.dot_dimension_numbers<[1], [0], [0], [1], [0, 0, 1, 1], [], []>} : vector<128x784xbf16>, vector<784x512xbf16>, vector<128x512xf32> -> vector<128x512xf32>
    %c0_3 = arith.constant 0 : index
    %c0_4 = arith.constant 0 : index
    %4 = vector.load %arg3[%c0_3, %c0_4] : memref<1x512xf32, #tpu.memory_space<vmem>>, vector<1x512xf32>
    %5 = vector.broadcast %4 : vector<1x512xf32> to vector<128x512xf32>
    %6 = arith.addf %3, %5 : vector<128x512xf32>
    %cst_5 = arith.constant 0.000000e+00 : f32
    %7 = vector.broadcast %cst_5 : f32 to vector<128x512xf32>
    %8 = arith.maximumf %6, %7 : vector<128x512xf32>
    %9 = arith.truncf %8 : vector<128x512xf32> to vector<128x512xbf16>
    %c0_6 = arith.constant 0 : index
    %c0_7 = arith.constant 0 : index
    %10 = vector.load %arg4[%c0_6, %c0_7] : memref<512x512xbf16, #tpu.memory_space<vmem>>, vector<512x512xbf16>
    %cst_8 = arith.constant dense<0.000000e+00> : vector<128x512xf32>
    %11 = tpu.matmul %9, %10, %cst_8 {dimension_numbers = #tpu.dot_dimension_numbers<[1], [0], [0], [1], [0, 0, 1, 1], [], []>} : vector<128x512xbf16>, vector<512x512xbf16>, vector<128x512xf32> -> vector<128x512xf32>
    %c0_9 = arith.constant 0 : index
    %c0_10 = arith.constant 0 : index
    %12 = vector.load %arg5[%c0_9, %c0_10] : memref<1x512xf32, #tpu.memory_space<vmem>>, vector<1x512xf32>
    %13 = vector.broadcast %12 : vector<1x512xf32> to vector<128x512xf32>
    %14 = arith.addf %11, %13 : vector<128x512xf32>
    %cst_11 = arith.constant 0.000000e+00 : f32
    %15 = vector.broadcast %cst_11 : f32 to vector<128x512xf32>
    %16 = arith.maximumf %14, %15 : vector<128x512xf32>
    %17 = arith.truncf %16 : vector<128x512xf32> to vector<128x512xbf16>
    %c0_12 = arith.constant 0 : index
    %c0_13 = arith.constant 0 : index
    %18 = vector.load %arg6[%c0_12, %c0_13] : memref<512x128xbf16, #tpu.memory_space<vmem>>, vector<512x128xbf16>
    %cst_14 = arith.constant dense<0.000000e+00> : vector<128x128xf32>
    %19 = tpu.matmul %17, %18, %cst_14 {dimension_numbers = #tpu.dot_dimension_numbers<[1], [0], [0], [1], [0, 0, 1, 1], [], []>} : vector<128x512xbf16>, vector<512x128xbf16>, vector<128x128xf32> -> vector<128x128xf32>
    %c0_15 = arith.constant 0 : index
    %c0_16 = arith.constant 0 : index
    %20 = vector.load %arg7[%c0_15, %c0_16] : memref<1x128xf32, #tpu.memory_space<vmem>>, vector<1x128xf32>
    %21 = vector.broadcast %20 : vector<1x128xf32> to vector<128x128xf32>
    %22 = arith.addf %19, %21 : vector<128x128xf32>
    %c0_17 = arith.constant 0 : index
    %c0_18 = arith.constant 0 : index
    %23 = vector.load %arg8[%c0_17, %c0_18] : memref<128x128xf32, #tpu.memory_space<vmem>>, vector<128x128xf32>
    tpu.vector_store %arg8[%c0_17, %c0_18], %22 {strides = array<i32>} : memref<128x128xf32, #tpu.memory_space<vmem>>, vector<128x128xf32>,
    return
  }
  func.func @transform_0(%arg0: i32) -> (i32, i32) {
    %c0_i32 = arith.constant 0 : i32
    %c0_i32_0 = arith.constant 0 : i32
    return %arg0, %c0_i32 : i32, i32
  }
  func.func @transform_1(%arg0: i32) -> (i32, i32) {
    %c0_i32 = arith.constant 0 : i32
    %c0_i32_0 = arith.constant 0 : i32
    %c0_i32_1 = arith.constant 0 : i32
    return %c0_i32, %c0_i32_0 : i32, i32
  }
  func.func @transform_2(%arg0: i32) -> (i32, i32) {
    %c0_i32 = arith.constant 0 : i32
    %c0_i32_0 = arith.constant 0 : i32
    %c0_i32_1 = arith.constant 0 : i32
    return %c0_i32, %c0_i32_0 : i32, i32
  }
  func.func @transform_3(%arg0: i32) -> (i32, i32) {
    %c0_i32 = arith.constant 0 : i32
    %c0_i32_0 = arith.constant 0 : i32
    %c0_i32_1 = arith.constant 0 : i32
    return %c0_i32, %c0_i32_0 : i32, i32
  }
  func.func @transform_4(%arg0: i32) -> (i32, i32) {
    %c0_i32 = arith.constant 0 : i32
    %c0_i32_0 = arith.constant 0 : i32
    %c0_i32_1 = arith.constant 0 : i32
    return %c0_i32, %c0_i32_0 : i32, i32
  }
  func.func @transform_5(%arg0: i32) -> (i32, i32) {
    %c0_i32 = arith.constant 0 : i32
    %c0_i32_0 = arith.constant 0 : i32
    %c0_i32_1 = arith.constant 0 : i32
    return %c0_i32, %c0_i32_0 : i32, i32
  }
  func.func @transform_6(%arg0: i32) -> (i32, i32) {
    %c0_i32 = arith.constant 0 : i32
    %c0_i32_0 = arith.constant 0 : i32
    %c0_i32_1 = arith.constant 0 : i32
    return %c0_i32, %c0_i32_0 : i32, i32
  }
  func.func @transform_7(%arg0: i32) -> (i32, i32) {
    %c0_i32 = arith.constant 0 : i32
    %c0_i32_0 = arith.constant 0 : i32
    return %arg0, %c0_i32 : i32, i32
  }
}

</mosaic_0001>

<bundles_post_ra>
// kernel: neural_net_forward.1
= control target key start
LH: loop header
LB: loop body
LE: loop exit
PB: predicated region body
PF: predicated region fallthrough
CT: control target
= control target key end

     0   :  { %12 = vsyncpa [#allocation3], 0  ;;  %s6557_s0 = inlined_call_operand.vmem [shape: f32[128,784], index: 0, kind: input, shape index: {}]   ;;  %s6558_s1 = inlined_call_operand.hbm [shape: bf16[784,512], index: 1, kind: input, shape index: {}]   ;;  %s6559_s2 = inlined_call_operand.vmem [shape: f32[1,512], index: 2, kind: input, shape index: {}]   ;;  %s6560_s3 = inlined_call_operand.hbm [shape: bf16[512,512], index: 3, kind: input, shape index: {}]   ;;  %s6561_s4 = inlined_call_operand.vmem [shape: f32[1,512], index: 4, kind: input, shape index: {}]   ;;  %s6562_s5 = inlined_call_operand.vmem [shape: bf16[512,128], index: 5, kind: input, shape index: {}]   ;;  %s6563_s6 = inlined_call_operand.vmem [shape: f32[1,128], index: 6, kind: input, shape index: {}]   ;;  %s6564_s7 = inlined_call_operand.vmem [shape: f32[128,128], index: 7, kind: output, shape index: {}]  }
   0x1   :  { %13 = vsyncpa [#allocation5], 0  ;;  %s5719_s24 = smov [#allocation2]   ;;  %s5671_s28 = scalar_lea.hbm %s6558_s1, 25088 }
   0x2   :  { %s21_s25 = sshll.u32 %s5719_s24, 4  ;;  %p5672_p0 = scmp.ne.s32.totalorder %s6558_s1, %s5671_s28  ;;  %s22_s25 = int_to_ptr.vmem [resolvable:$true] %s21_s25 }
   0x3   :  { %p5675_p1 = scmp.lt.u32.totalorder %s5671_s28, %s6558_s1 }
   0x5   :  { %p5677_p2 = pnand %p5675_p1, %p5672_p0 }
   0x7   :  { %5680 = shalt.err (!%p5677_p2)
}
   0x8   :  { %s5681_s10 = scalar_lea.vmem %s22_s25, 25088  ;;  %p5686_p4 = scmp.lt.s32.totalorder %s22_s25, %s22_s25 }
   0x9   :  { %p5682_p3 = scmp.ne.s32.totalorder %s22_s25, %s5681_s10  ;;  %p5687_p5 = scmp.lt.s32.totalorder %s5681_s10, %s5681_s10 }
   0xb   :  { %p5688_p6 = por %p5687_p5, %p5686_p4 }
   0xd   :  { %p5689_p7 = pnand %p5688_p6, %p5682_p3 }
   0xf   :  { %5692 = shalt.err (!%p5689_p7)
}
  0x10   :  { %s5720_s11 = smov 256   ;;  %s5721_s12 = smov 16  }
  0x11   :  { %27 = dma.hbm_to_vmem [thread:$0]  %s6558_s1, 25088, %s22_s25, [#allocation3], %s5720_s11, %s5720_s11, %s5721_s12  }
  0x12   :  { %s5722_s15 = smov [#allocation4]   ;;  %s5693_s19 = scalar_lea.hbm %s6560_s3, 16384 }
  0x13   :  { %s35_s16 = sshll.u32 %s5722_s15, 4  ;;  %p5694_p8 = scmp.ne.s32.totalorder %s6560_s3, %s5693_s19  ;;  %s36_s16 = int_to_ptr.vmem [resolvable:$true] %s35_s16 }
  0x14   :  { %p5697_p9 = scmp.lt.u32.totalorder %s5693_s19, %s6560_s3 }
  0x16   :  { %p5699_p10 = pnand %p5697_p9, %p5694_p8 }
  0x18   :  { %5702 = shalt.err (!%p5699_p10)
}
  0x19   :  { %s5703_s24 = scalar_lea.vmem %s36_s16, 16384  ;;  %p5708_p12 = scmp.lt.s32.totalorder %s36_s16, %s36_s16 }
  0x1a   :  { %p5704_p11 = scmp.ne.s32.totalorder %s36_s16, %s5703_s24  ;;  %p5709_p13 = scmp.lt.s32.totalorder %s5703_s24, %s5703_s24 }
  0x1c   :  { %p5710_p0 = por %p5709_p13, %p5708_p12 }
  0x1e   :  { %p5711_p1 = pnand %p5710_p0, %p5704_p11 }
  0x20   :  { %5714 = shalt.err (!%p5711_p1)
}
  0x21   :  { %41 = dma.hbm_to_vmem [thread:$0]  %s6560_s3, 16384, %s36_s16, [#allocation5], %s5720_s11, %s5720_s11, %s5721_s12  }
  0x22   :  { %5715 = dma.done.wait [#allocation3], 25088  }
  0x23   :  { %5716 = vsyncadd [#allocation3], 4294942208 }
  0x24   :  { %5717 = dma.done.wait [#allocation5], 16384  }
  0x25   :  { %5718 = vsyncadd [#allocation5], 4294950912  ;;  %v5153_v0 = vld [vmem:[#allocation2 + $0x4] ss:$16 sps:$4 sm:$0xff]   ;;  %v5155_v1 = vld [vmem:[#allocation2 + $0xc] ss:$16 sps:$4 sm:$0xff]  }
  0x26   :  { %1446 = vmatprep.subr.bf16.mxu0 %v5153_v0  ;;  %v5157_v2 = vld [vmem:[#allocation2] ss:$16 sps:$4 sm:$0xff]   ;;  %v5158_v3 = vld [vmem:[#allocation2 + $0x8] ss:$16 sps:$4 sm:$0xff]   ;;  %1898 = vmatprep.subr.bf16.mxu1 %v5155_v1  ;;  %v5159_v4 = vld [vmem:[#allocation2 + $0x24] ss:$16 sps:$4 sm:$0xff]  }
  0x27   :  { %1447 = vmatpush1.bf16.msra.mxu0 %v5157_v2  ;;  %1899 = vmatpush1.bf16.msra.mxu1 %v5158_v3  ;;  %v5161_v5 = vld [vmem:[#allocation2 + $0x2c] ss:$16 sps:$4 sm:$0xff]   ;;  %v5163_v6 = vld [vmem:[#allocation2 + $0x20] ss:$16 sps:$4 sm:$0xff]   ;;  %v5164_v7 = vld [vmem:[#allocation2 + $0x28] ss:$16 sps:$4 sm:$0xff]  }
  0x28   :  { %1448 = vmatprep.subr.bf16.mxu0 %v5159_v4  ;;  %1900 = vmatprep.subr.bf16.mxu1 %v5161_v5  ;;  %v5165_v8 = vld [vmem:[#allocation2 + $0x44] ss:$16 sps:$4 sm:$0xff]   ;;  %v5167_v9 = vld [vmem:[#allocation2 + $0x4c] ss:$16 sps:$4 sm:$0xff]   ;;  %v5169_v10 = vld [vmem:[#allocation2 + $0x40] ss:$16 sps:$4 sm:$0xff]  }
  0x29   :  { %v5170_v11 = vld [vmem:[#allocation2 + $0x48] ss:$16 sps:$4 sm:$0xff]   ;;  %v5171_v12 = vld [vmem:[#allocation2 + $0x64] ss:$16 sps:$4 sm:$0xff]   ;;  %v5173_v13 = vld [vmem:[#allocation2 + $0x6c] ss:$16 sps:$4 sm:$0xff]  }
  0x2a   :  { %v5175_v14 = vld [vmem:[#allocation2 + $0x60] ss:$16 sps:$4 sm:$0xff]   ;;  %v5176_v15 = vld [vmem:[#allocation2 + $0x68] ss:$16 sps:$4 sm:$0xff]   ;;  %v5177_v16 = vld [vmem:[#allocation2 + $0x84] ss:$16 sps:$4 sm:$0xff]  }
  0x2b   :  { %1449 = vmatpush1.bf16.msra.mxu0 %v5163_v6  ;;  %1901 = vmatpush1.bf16.msra.mxu1 %v5164_v7  ;;  %v5179_v17 = vld [vmem:[#allocation2 + $0x8c] ss:$16 sps:$4 sm:$0xff]   ;;  %v5181_v18 = vld [vmem:[#allocation2 + $0x80] ss:$16 sps:$4 sm:$0xff]   ;;  %v5182_v19 = vld [vmem:[#allocation2 + $0x88] ss:$16 sps:$4 sm:$0xff]  }
  0x2c   :  { %1450 = vmatprep.subr.bf16.mxu0 %v5165_v8  ;;  %1902 = vmatprep.subr.bf16.mxu1 %v5167_v9  ;;  %v5183_v20 = vld [vmem:[#allocation2 + $0xa4] ss:$16 sps:$4 sm:$0xff]   ;;  %v5185_v21 = vld [vmem:[#allocation2 + $0xac] ss:$16 sps:$4 sm:$0xff]   ;;  %v5187_v22 = vld [vmem:[#allocation2 + $0xa0] ss:$16 sps:$4 sm:$0xff]  }
  0x2d   :  { %v5188_v23 = vld [vmem:[#allocation2 + $0xa8] ss:$16 sps:$4 sm:$0xff]   ;;  %v5189_v24 = vld [vmem:[#allocation2 + $0xc4] ss:$16 sps:$4 sm:$0xff]   ;;  %v5191_v25 = vld [vmem:[#allocation2 + $0xcc] ss:$16 sps:$4 sm:$0xff]  }
  0x2e   :  { %v5193_v26 = vld [vmem:[#allocation2 + $0xc0] ss:$16 sps:$4 sm:$0xff]   ;;  %v5194_v27 = vld [vmem:[#allocation2 + $0xc8] ss:$16 sps:$4 sm:$0xff]   ;;  %v5195_v28 = vld [vmem:[#allocation2 + $0xe4] ss:$16 sps:$4 sm:$0xff]  }
  0x2f   :  { %1451 = vmatpush1.bf16.msra.mxu0 %v5169_v10  ;;  %1903 = vmatpush1.bf16.msra.mxu1 %v5170_v11  ;;  %v5197_v29 = vld [vmem:[#allocation2 + $0xec] ss:$16 sps:$4 sm:$0xff]   ;;  %v5199_v30 = vld [vmem:[#allocation2 + $0xe0] ss:$16 sps:$4 sm:$0xff]   ;;  %v5200_v31 = vld [vmem:[#allocation2 + $0xe8] ss:$16 sps:$4 sm:$0xff]  }
  0x30   :  { %1452 = vmatprep.subr.bf16.mxu0 %v5171_v12  ;;  %1904 = vmatprep.subr.bf16.mxu1 %v5173_v13  ;;  %v5201_v32 = vld [vmem:[#allocation2 + $0x104] ss:$16 sps:$4 sm:$0xff]   ;;  %v5203_v33 = vld [vmem:[#allocation2 + $0x10c] ss:$16 sps:$4 sm:$0xff]   ;;  %v5205_v34 = vld [vmem:[#allocation2 + $0x100] ss:$16 sps:$4 sm:$0xff]  }
  0x31   :  { %v5206_v35 = vld [vmem:[#allocation2 + $0x108] ss:$16 sps:$4 sm:$0xff]   ;;  %v5207_v36 = vld [vmem:[#allocation2 + $0x124] ss:$16 sps:$4 sm:$0xff]   ;;  %v5209_v37 = vld [vmem:[#allocation2 + $0x12c] ss:$16 sps:$4 sm:$0xff]  }
  0x32   :  { %v5211_v38 = vld [vmem:[#allocation2 + $0x120] ss:$16 sps:$4 sm:$0xff]   ;;  %v5212_v39 = vld [vmem:[#allocation2 + $0x128] ss:$16 sps:$4 sm:$0xff]   ;;  %v5213_v40 = vld [vmem:[#allocation2 + $0x144] ss:$16 sps:$4 sm:$0xff]  }
  0x33   :  { %1453 = vmatpush1.bf16.msra.mxu0 %v5175_v14  ;;  %1905 = vmatpush1.bf16.msra.mxu1 %v5176_v15  ;;  %v5215_v41 = vld [vmem:[#allocation2 + $0x14c] ss:$16 sps:$4 sm:$0xff]   ;;  %v5217_v42 = vld [vmem:[#allocation2 + $0x140] ss:$16 sps:$4 sm:$0xff]   ;;  %v5218_v43 = vld [vmem:[#allocation2 + $0x148] ss:$16 sps:$4 sm:$0xff]  }
  0x34   :  { %1454 = vmatprep.subr.bf16.mxu0 %v5177_v16  ;;  %1906 = vmatprep.subr.bf16.mxu1 %v5179_v17  ;;  %v5219_v44 = vld [vmem:[#allocation2 + $0x164] ss:$16 sps:$4 sm:$0xff]   ;;  %v5221_v45 = vld [vmem:[#allocation2 + $0x16c] ss:$16 sps:$4 sm:$0xff]   ;;  %v5223_v47 = vld [vmem:[#allocation2 + $0x160] ss:$16 sps:$4 sm:$0xff]  }
  0x35   :  { %v56_v46 = vld [vmem:[%s6557_s0 + $0x8] sm:$0xff]  ;;  %v63_v49 = vld [vmem:[%s6557_s0 + $0x40] sm:$0xff]  ;;  %v62_v4 = vld [vmem:[%s6557_s0 + $0x38] sm:$0xff]  ;;  %vm1421_vm0 = vcmask 130048  }
  0x36   :  { %v5224_v48 = vld [vmem:[#allocation2 + $0x168] ss:$16 sps:$4 sm:$0xff]   ;;  %v5225_v50 = vld [vmem:[#allocation2 + $0x184] ss:$16 sps:$4 sm:$0xff]   ;;  %v168_v51 = vpack.c.bf16 %v63_v49, %v56_v46  ;;  %v5227_v52 = vld [vmem:[#allocation2 + $0x18c] ss:$16 sps:$4 sm:$0xff]  }
  0x37   :  { %1455 = vmatpush1.bf16.msra.mxu0 %v5181_v18  ;;  %1907 = vmatpush1.bf16.msra.mxu1 %v5182_v19  ;;  %v5229_v53 = vld [vmem:[#allocation2 + $0x180] ss:$16 sps:$4 sm:$0xff]   ;;  %v5230_v54 = vld [vmem:[#allocation2 + $0x188] ss:$16 sps:$4 sm:$0xff]   ;;  %v5231_v55 = vld [vmem:[#allocation2 + $0x1a4] ss:$16 sps:$4 sm:$0xff]  }
  0x38   :  { %1456 = vmatprep.subr.bf16.mxu0 %v5183_v20  ;;  %1908 = vmatprep.subr.bf16.mxu1 %v5185_v21  ;;  %v5233_v56 = vld [vmem:[#allocation2 + $0x1ac] ss:$16 sps:$4 sm:$0xff]   ;;  %v5235_v57 = vld [vmem:[#allocation2 + $0x1a0] ss:$16 sps:$4 sm:$0xff]   ;;  %v5236_v58 = vld [vmem:[#allocation2 + $0x1a8] ss:$16 sps:$4 sm:$0xff]  }
  0x39   :  { %1478 = vmatprep.mubr.bf16.mxu0 %v168_v51  ;;  %1930 = vmatprep.mubr.bf16.mxu1 %v168_v51  ;;  %v5237_v59 = vld [vmem:[#allocation2 + $0x1c4] ss:$16 sps:$4 sm:$0xff]   ;;  %v5239_v60 = vld [vmem:[#allocation2 + $0x1cc] ss:$16 sps:$4 sm:$0xff]   ;;  %v5241_v61 = vld [vmem:[#allocation2 + $0x1c0] ss:$16 sps:$4 sm:$0xff]  }
  0x3a   :  { %v5242_v62 = vld [vmem:[#allocation2 + $0x1c8] ss:$16 sps:$4 sm:$0xff]   ;;  %v5243_v63 = vld [vmem:[#allocation2 + $0x1e4] ss:$16 sps:$4 sm:$0xff]   ;;  %v5245_v0 = vld [vmem:[#allocation2 + $0x1ec] ss:$16 sps:$4 sm:$0xff]  }
  0x3b   :  { %1457 = vmatpush1.bf16.msra.mxu0 %v5187_v22  ;;  %1909 = vmatpush1.bf16.msra.mxu1 %v5188_v23  ;;  %v5247_v1 = vld [vmem:[#allocation2 + $0x1e0] ss:$16 sps:$4 sm:$0xff]   ;;  %v5248_v2 = vld [vmem:[#allocation2 + $0x1e8] ss:$16 sps:$4 sm:$0xff]   ;;  %v5251_v5 = vld [vmem:[#allocation2 + $0x204] ss:$16 sps:$4 sm:$0xff]  }
  0x3c   :  { %1458 = vmatprep.subr.bf16.mxu0 %v5189_v24  ;;  %1910 = vmatprep.subr.bf16.mxu1 %v5191_v25  ;;  %v55_v3 = vld [vmem:[%s6557_s0] sm:$0xff]  ;;  %v5254_v6 = vld [vmem:[#allocation2 + $0x20c] ss:$16 sps:$4 sm:$0xff]   ;;  %v5252_v9 = vld [vmem:[#allocation2 + $0x208] ss:$16 sps:$4 sm:$0xff]  }
  0x3d   :  { %v5249_v7 = vld [vmem:[#allocation2 + $0x200] ss:$16 sps:$4 sm:$0xff]   ;;  %v167_v8 = vpack.c.bf16 %v62_v4, %v55_v3  ;;  %v70_v10 = vld [vmem:[%s6557_s0 + $0x78] sm:$0xff]  ;;  %v5257_v12 = vld [vmem:[#allocation2 + $0x224] ss:$16 sps:$4 sm:$0xff]  }
  0x3e   :  { %v77_v11 = vld [vmem:[%s6557_s0 + $0xb0] sm:$0xff]  ;;  %v5260_v13 = vld [vmem:[#allocation2 + $0x22c] ss:$16 sps:$4 sm:$0xff]   ;;  %v5258_v16 = vld [vmem:[#allocation2 + $0x228] ss:$16 sps:$4 sm:$0xff]  }
  0x3f   :  { %1459 = vmatpush1.bf16.msra.mxu0 %v5193_v26  ;;  %1911 = vmatpush1.bf16.msra.mxu1 %v5194_v27  ;;  %v5255_v14 = vld [vmem:[#allocation2 + $0x220] ss:$16 sps:$4 sm:$0xff]   ;;  %v175_v15 = vpack.c.bf16 %v77_v11, %v70_v10  ;;  %v76_v18 = vld [vmem:[%s6557_s0 + $0xa8] sm:$0xff]  ;;  %v5263_v19 = vld [vmem:[#allocation2 + $0x244] ss:$16 sps:$4 sm:$0xff]  }
  0x40   :  { %1460 = vmatprep.subr.bf16.mxu0 %v5195_v28  ;;  %1912 = vmatprep.subr.bf16.mxu1 %v5197_v29  ;;  %v69_v17 = vld [vmem:[%s6557_s0 + $0x70] sm:$0xff]  ;;  %v5266_v20 = vld [vmem:[#allocation2 + $0x24c] ss:$16 sps:$4 sm:$0xff]   ;;  %v5264_v22 = vld [vmem:[#allocation2 + $0x248] ss:$16 sps:$4 sm:$0xff]  }
  0x41   :  { %v5261_v21 = vld [vmem:[#allocation2 + $0x240] ss:$16 sps:$4 sm:$0xff]   ;;  %v174_v23 = vpack.c.bf16 %v76_v18, %v69_v17  ;;  %v84_v24 = vld [vmem:[%s6557_s0 + $0xe8] sm:$0xff]  ;;  %v5269_v26 = vld [vmem:[#allocation2 + $0x264] ss:$16 sps:$4 sm:$0xff]  }
  0x42   :  { %v91_v25 = vld [vmem:[%s6557_s0 + $0x120] sm:$0xff]  ;;  %v5272_v27 = vld [vmem:[#allocation2 + $0x26c] ss:$16 sps:$4 sm:$0xff]   ;;  %v5300_v3 = vld [vmem:[#allocation2 + $0x308] ss:$16 sps:$4 sm:$0xff]  }
  0x43   :  { %1461 = vmatpush1.bf16.msra.mxu0 %v5199_v30  ;;  %1913 = vmatpush1.bf16.msra.mxu1 %v5200_v31  ;;  %v182_v28 = vpack.c.bf16 %v91_v25, %v84_v24  ;;  %v5267_v29 = vld [vmem:[#allocation2 + $0x260] ss:$16 sps:$4 sm:$0xff]   ;;  %v5270_v30 = vld [vmem:[#allocation2 + $0x268] ss:$16 sps:$4 sm:$0xff]   ;;  %v5305_v4 = vld [vmem:[#allocation2 + $0x324] ss:$16 sps:$4 sm:$0xff]  }
  0x44   :  { %1462 = vmatprep.subr.bf16.mxu0 %v5201_v32  ;;  %1914 = vmatprep.subr.bf16.mxu1 %v5203_v33  ;;  %v83_v31 = vld [vmem:[%s6557_s0 + $0xe0] sm:$0xff]  ;;  %v90_v32 = vld [vmem:[%s6557_s0 + $0x118] sm:$0xff]  ;;  %v104_v46 = vld [vmem:[%s6557_s0 + $0x188] sm:$0xff] }
  0x45   :  { %v5275_v33 = vld [vmem:[#allocation2 + $0x284] ss:$16 sps:$4 sm:$0xff]   ;;  %v5285_v49 = vld [vmem:[#allocation2 + $0x2c0] ss:$16 sps:$4 sm:$0xff]   ;;  %v112_v51 = vld [vmem:[%s6557_s0 + $0x1c8] sm:$0xff] }
  0x46   :  { %v132_v10 = vld [vmem:[%s6557_s0 + $0x268] sm:$0xff]  ;;  %v5311_v11 = vld [vmem:[#allocation2 + $0x344] ss:$16 sps:$4 sm:$0xff]   ;;  %v146_v24 = vld [vmem:[%s6557_s0 + $0x2d8] sm:$0xff] }
  0x47   :  { %1463 = vmatpush1.bf16.msra.mxu0 %v5205_v34  ;;  %1915 = vmatpush1.bf16.msra.mxu1 %v5206_v35  ;;  %v5278_v34 = vld [vmem:[#allocation2 + $0x28c] ss:$16 sps:$4 sm:$0xff]   ;;  %v5273_v35 = vld [vmem:[#allocation2 + $0x280] ss:$16 sps:$4 sm:$0xff]   ;;  %v5317_v18 = vld [vmem:[#allocation2 + $0x364] ss:$16 sps:$4 sm:$0xff]  }
  0x48   :  { %1464 = vmatprep.subr.bf16.mxu0 %v5207_v36  ;;  %1916 = vmatprep.subr.bf16.mxu1 %v5209_v37  ;;  %v5276_v36 = vld [vmem:[#allocation2 + $0x288] ss:$16 sps:$4 sm:$0xff]   ;;  %v181_v37 = vpack.c.bf16 %v90_v32, %v83_v31  ;;  %v147_v17 = vld [vmem:[%s6557_s0 + $0x2e0] sm:$0xff]  ;;  %v161_v31 = vld [vmem:[%s6557_s0 + $0x350] sm:$0xff] }
  0x49   :  { %v5323_v25 = vld [vmem:[#allocation2 + $0x384] ss:$16 sps:$4 sm:$0xff]  }
  0x4a   :  { %v5329_v32 = vld [vmem:[#allocation2 + $0x3a4] ss:$16 sps:$4 sm:$0xff]  }
  0x4b   :  { %1465 = vmatpush1.bf16.msra.mxu0 %v5211_v38  ;;  %1917 = vmatpush1.bf16.msra.mxu1 %v5212_v39  ;;  %v98_v38 = vld [vmem:[%s6557_s0 + $0x158] sm:$0xff]  ;;  %v105_v39 = vld [vmem:[%s6557_s0 + $0x190] sm:$0xff] }
  0x4c   :  { %1466 = vmatprep.subr.bf16.mxu0 %v5213_v40  ;;  %1918 = vmatprep.subr.bf16.mxu1 %v5215_v41  ;;  %v5281_v40 = vld [vmem:[#allocation2 + $0x2a4] ss:$16 sps:$4 sm:$0xff]   ;;  %v5284_v41 = vld [vmem:[#allocation2 + $0x2ac] ss:$16 sps:$4 sm:$0xff]  }
  0x4f   :  { %1467 = vmatpush1.bf16.msra.mxu0 %v5217_v42  ;;  %1919 = vmatpush1.bf16.msra.mxu1 %v5218_v43  ;;  %v5279_v42 = vld [vmem:[#allocation2 + $0x2a0] ss:$16 sps:$4 sm:$0xff]   ;;  %v189_v43 = vpack.c.bf16 %v105_v39, %v98_v38  ;;  %v160_v38 = vld [vmem:[%s6557_s0 + $0x348] sm:$0xff]  ;;  %v5335_v39 = vld [vmem:[#allocation2 + $0x3c4] ss:$16 sps:$4 sm:$0xff]  }
  0x50   :  { %1468 = vmatprep.subr.bf16.mxu0 %v5219_v44  ;;  %1920 = vmatprep.subr.bf16.mxu1 %v5221_v45  ;;  %v5282_v44 = vld [vmem:[#allocation2 + $0x2a8] ss:$16 sps:$4 sm:$0xff]   ;;  %v97_v45 = vld [vmem:[%s6557_s0 + $0x150] sm:$0xff] }
  0x53   :  { %1469 = vmatpush1.bf16.msra.mxu0 %v5223_v47  ;;  %1921 = vmatpush1.bf16.msra.mxu1 %v5224_v48  ;;  %v5287_v47 = vld [vmem:[#allocation2 + $0x2c4] ss:$16 sps:$4 sm:$0xff]   ;;  %v5290_v48 = vld [vmem:[#allocation2 + $0x2cc] ss:$16 sps:$4 sm:$0xff]  }
  0x54   :  { %1470 = vmatprep.subr.bf16.mxu0 %v5225_v50  ;;  %1922 = vmatprep.subr.bf16.mxu1 %v5227_v52  ;;  %v188_v50 = vpack.c.bf16 %v104_v46, %v97_v45  ;;  %v119_v52 = vld [vmem:[%s6557_s0 + $0x200] sm:$0xff]  ;;  %v65_v45 = vld [vmem:[%s6557_s0 + $0x50] sm:$0xff] }
  0x55   :  { %v5341_v46 = vld [vmem:[#allocation2 + $0x3e4] ss:$16 sps:$4 sm:$0xff]  }
  0x57   :  { %1471 = vmatpush1.bf16.msra.mxu0 %v5229_v53  ;;  %1923 = vmatpush1.bf16.msra.mxu1 %v5230_v54  ;;  %v5288_v53 = vld [vmem:[#allocation2 + $0x2c8] ss:$16 sps:$4 sm:$0xff]   ;;  %v5293_v54 = vld [vmem:[#allocation2 + $0x2e4] ss:$16 sps:$4 sm:$0xff]  }
  0x58   :  { %1472 = vmatprep.subr.bf16.mxu0 %v5231_v55  ;;  %1924 = vmatprep.subr.bf16.mxu1 %v5233_v56  ;;  %v5296_v55 = vld [vmem:[#allocation2 + $0x2ec] ss:$16 sps:$4 sm:$0xff]   ;;  %v5291_v56 = vld [vmem:[#allocation2 + $0x2e0] ss:$16 sps:$4 sm:$0xff]  }
  0x5b   :  { %1473 = vmatpush1.bf16.msra.mxu0 %v5235_v57  ;;  %1925 = vmatpush1.bf16.msra.mxu1 %v5236_v58  ;;  %v5294_v57 = vld [vmem:[#allocation2 + $0x2e8] ss:$16 sps:$4 sm:$0xff]   ;;  %v196_v58 = vpack.c.bf16 %v119_v52, %v112_v51  ;;  %v57_v51 = vld [vmem:[%s6557_s0 + $0x10] sm:$0xff] }
  0x5c   :  { %1474 = vmatprep.subr.bf16.mxu0 %v5237_v59  ;;  %1926 = vmatprep.subr.bf16.mxu1 %v5239_v60  ;;  %v111_v59 = vld [vmem:[%s6557_s0 + $0x1c0] sm:$0xff]  ;;  %v118_v60 = vld [vmem:[%s6557_s0 + $0x1f8] sm:$0xff]  ;;  %v64_v52 = vld [vmem:[%s6557_s0 + $0x48] sm:$0xff] }
  0x5f   :  { %1475 = vmatpush1.bf16.msra.mxu0 %v5241_v61  ;;  %1927 = vmatpush1.bf16.msra.mxu1 %v5242_v62  ;;  %v5299_v61 = vld [vmem:[#allocation2 + $0x304] ss:$16 sps:$4 sm:$0xff]   ;;  %v5302_v62 = vld [vmem:[#allocation2 + $0x30c] ss:$16 sps:$4 sm:$0xff]  }
  0x60   :  { %1476 = vmatprep.subr.bf16.mxu0 %v5243_v63  ;;  %1928 = vmatprep.subr.bf16.mxu1 %v5245_v0  ;;  %v195_v63 = vpack.c.bf16 %v118_v60, %v111_v59  ;;  %v126_v0 = vld [vmem:[%s6557_s0 + $0x238] sm:$0xff]  ;;  %v5353_v60 = vld [vmem:[#allocation2 + $0x424] ss:$16 sps:$4 sm:$0xff]  }
  0x61   :  { %v5348_v59 = vld [vmem:[#allocation2 + $0x408] ss:$16 sps:$4 sm:$0xff]  }
  0x63   :  { %1477 = vmatpush1.bf16.msra.mxu0 %v5247_v1  ;;  %1929 = vmatpush1.bf16.msra.mxu1 %v5248_v2  ;;  %v133_v1 = vld [vmem:[%s6557_s0 + $0x270] sm:$0xff] }
  0x64   :  { %1559 = vmatprep.subr.bf16.mxu0 %v5251_v5  ;;  %2011 = vmatprep.subr.bf16.mxu1 %v5254_v6  ;;  %v5297_v2 = vld [vmem:[#allocation2 + $0x300] ss:$16 sps:$4 sm:$0xff]   ;;  %v5308_v5 = vld [vmem:[#allocation2 + $0x32c] ss:$16 sps:$4 sm:$0xff]  }
  0x65   :  { %v5303_v6 = vld [vmem:[#allocation2 + $0x320] ss:$16 sps:$4 sm:$0xff]  }
  0x66   :  { %1479 = vmatmul.mubr.bf16.vlgmr.msra.gmra.mrb[0].mxu0 %v167_v8  ;;  %1931 = vmatmul.mubr.bf16.vlgmr.msra.gmra.mrb[0].mxu1 %v167_v8  ;;  %v203_v8 = vpack.c.bf16 %v133_v1, %v126_v0  ;;  %v71_v1 = vld [vmem:[%s6557_s0 + $0x80] sm:$0xff] }
  0x67   :  { %1560 = vmatpush1.bf16.msra.mxu0 %v5249_v7  ;;  %2012 = vmatpush1.bf16.msra.mxu1 %v5252_v9  ;;  %v5306_v7 = vld [vmem:[#allocation2 + $0x328] ss:$16 sps:$4 sm:$0xff]   ;;  %v125_v9 = vld [vmem:[%s6557_s0 + $0x230] sm:$0xff] }
  0x68   :  { %1561 = vmatprep.subr.bf16.mxu0 %v5257_v12  ;;  %2013 = vmatprep.subr.bf16.mxu1 %v5260_v13  ;;  %v5314_v12 = vld [vmem:[#allocation2 + $0x34c] ss:$16 sps:$4 sm:$0xff]   ;;  %v5309_v13 = vld [vmem:[#allocation2 + $0x340] ss:$16 sps:$4 sm:$0xff]  }
  0x69   :  { %1488 = vmatprep.mubr.bf16.mxu0 %v175_v15  ;;  %1940 = vmatprep.mubr.bf16.mxu1 %v175_v15  ;;  %v5312_v15 = vld [vmem:[#allocation2 + $0x348] ss:$16 sps:$4 sm:$0xff]  }
  0x6b   :  { %1562 = vmatpush1.bf16.msra.mxu0 %v5255_v14  ;;  %2014 = vmatpush1.bf16.msra.mxu1 %v5258_v16  ;;  %v202_v14 = vpack.c.bf16 %v132_v10, %v125_v9  ;;  %v140_v16 = vld [vmem:[%s6557_s0 + $0x2a8] sm:$0xff]  ;;  %v5365_v10 = vld [vmem:[#allocation2 + $0x464] ss:$16 sps:$4 sm:$0xff]  }
  0x6c   :  { %1563 = vmatprep.subr.bf16.mxu0 %v5263_v19  ;;  %2015 = vmatprep.subr.bf16.mxu1 %v5266_v20  ;;  %v5320_v19 = vld [vmem:[#allocation2 + $0x36c] ss:$16 sps:$4 sm:$0xff]   ;;  %v5315_v20 = vld [vmem:[#allocation2 + $0x360] ss:$16 sps:$4 sm:$0xff]   ;;  %v5360_v9 = vld [vmem:[#allocation2 + $0x448] ss:$16 sps:$4 sm:$0xff]  }
  0x6e   :  { %1489 = vmatmul.mubr.bf16.gmra.mrb[4].mxu0 %v174_v23  ;;  %1941 = vmatmul.mubr.bf16.gmra.mrb[4].mxu1 %v174_v23  ;;  %v139_v23 = vld [vmem:[%s6557_s0 + $0x2a0] sm:$0xff] }
  0x6f   :  { %1564 = vmatpush1.bf16.msra.mxu0 %v5261_v21  ;;  %2016 = vmatpush1.bf16.msra.mxu1 %v5264_v22  ;;  %v210_v21 = vpack.c.bf16 %v147_v17, %v140_v16  ;;  %v5318_v22 = vld [vmem:[#allocation2 + $0x368] ss:$16 sps:$4 sm:$0xff]   ;;  %v5371_v17 = vld [vmem:[#allocation2 + $0x484] ss:$16 sps:$4 sm:$0xff]  }
  0x70   :  { %1565 = vmatprep.subr.bf16.mxu0 %v5269_v26  ;;  %2017 = vmatprep.subr.bf16.mxu1 %v5272_v27  ;;  %v5326_v26 = vld [vmem:[#allocation2 + $0x38c] ss:$16 sps:$4 sm:$0xff]   ;;  %v5321_v27 = vld [vmem:[#allocation2 + $0x380] ss:$16 sps:$4 sm:$0xff]  }
  0x71   :  { %1498 = vmatprep.mubr.bf16.mxu0 %v182_v28  ;;  %1950 = vmatprep.mubr.bf16.mxu1 %v182_v28  ;;  %v5324_v28 = vld [vmem:[#allocation2 + $0x388] ss:$16 sps:$4 sm:$0xff]  }
  0x72   :  { %v92_v16 = vld [vmem:[%s6557_s0 + $0x128] sm:$0xff] }
  0x73   :  { %1566 = vmatpush1.bf16.msra.mxu0 %v5267_v29  ;;  %2018 = vmatpush1.bf16.msra.mxu1 %v5270_v30  ;;  %v209_v29 = vpack.c.bf16 %v146_v24, %v139_v23  ;;  %v154_v30 = vld [vmem:[%s6557_s0 + $0x318] sm:$0xff]  ;;  %v107_v23 = vld [vmem:[%s6557_s0 + $0x1a0] sm:$0xff] }
  0x74   :  { %1567 = vmatprep.subr.bf16.mxu0 %v5275_v33  ;;  %2019 = vmatprep.subr.bf16.mxu1 %v5278_v34  ;;  %v5332_v33 = vld [vmem:[#allocation2 + $0x3ac] ss:$16 sps:$4 sm:$0xff]   ;;  %v217_v34 = vpack.c.bf16 %v161_v31, %v154_v30  ;;  %v5377_v24 = vld [vmem:[#allocation2 + $0x4a4] ss:$16 sps:$4 sm:$0xff]  }
  0x75   :  { %v106_v30 = vld [vmem:[%s6557_s0 + $0x198] sm:$0xff]  ;;  %v5383_v31 = vld [vmem:[#allocation2 + $0x4c4] ss:$16 sps:$4 sm:$0xff]  }
  0x76   :  { %1499 = vmatmul.mubr.bf16.gmra.mrb[8].mxu0 %v181_v37  ;;  %1951 = vmatmul.mubr.bf16.gmra.mrb[8].mxu1 %v181_v37  ;;  %v153_v37 = vld [vmem:[%s6557_s0 + $0x310] sm:$0xff] }
  0x77   :  { %1568 = vmatpush1.bf16.msra.mxu0 %v5273_v35  ;;  %2020 = vmatpush1.bf16.msra.mxu1 %v5276_v36  ;;  %v5327_v35 = vld [vmem:[#allocation2 + $0x3a0] ss:$16 sps:$4 sm:$0xff]   ;;  %v5330_v36 = vld [vmem:[#allocation2 + $0x3a8] ss:$16 sps:$4 sm:$0xff]  }
  0x78   :  { %1569 = vmatprep.subr.bf16.mxu0 %v5281_v40  ;;  %2021 = vmatprep.subr.bf16.mxu1 %v5284_v41  ;;  %v5338_v40 = vld [vmem:[#allocation2 + $0x3cc] ss:$16 sps:$4 sm:$0xff]   ;;  %v5333_v41 = vld [vmem:[#allocation2 + $0x3c0] ss:$16 sps:$4 sm:$0xff]  }
  0x79   :  { %1508 = vmatprep.mubr.bf16.mxu0 %v189_v43  ;;  %1960 = vmatprep.mubr.bf16.mxu1 %v189_v43  ;;  %v216_v43 = vpack.c.bf16 %v160_v38, %v153_v37  ;;  %v5384_v37 = vld [vmem:[#allocation2 + $0x4c8] ss:$16 sps:$4 sm:$0xff]   ;;  %v5389_v38 = vld [vmem:[#allocation2 + $0x4e4] ss:$16 sps:$4 sm:$0xff]  }
  0x7b   :  { %1570 = vmatpush1.bf16.msra.mxu0 %v5279_v42  ;;  %2022 = vmatpush1.bf16.msra.mxu1 %v5282_v44  ;;  %v5336_v42 = vld [vmem:[#allocation2 + $0x3c8] ss:$16 sps:$4 sm:$0xff]  }
  0x7c   :  { %1571 = vmatprep.subr.bf16.mxu0 %v5287_v47  ;;  %2023 = vmatprep.subr.bf16.mxu1 %v5290_v48  ;;  %v58_v44 = vld [vmem:[%s6557_s0 + $0x18] sm:$0xff]  ;;  %v5339_v48 = vld [vmem:[#allocation2 + $0x3e0] ss:$16 sps:$4 sm:$0xff]  }
  0x7d   :  { %v5344_v47 = vld [vmem:[#allocation2 + $0x3ec] ss:$16 sps:$4 sm:$0xff]  }
  0x7e   :  { %1509 = vmatmul.mubr.bf16.gmra.mrb[12].mxu0 %v188_v50  ;;  %1961 = vmatmul.mubr.bf16.gmra.mrb[12].mxu1 %v188_v50  ;;  %v5342_v50 = vld [vmem:[#allocation2 + $0x3e8] ss:$16 sps:$4 sm:$0xff]  }
  0x7f   :  { %1572 = vmatpush1.bf16.msra.mxu0 %v5285_v49  ;;  %2024 = vmatpush1.bf16.msra.mxu1 %v5288_v53  ;;  %v170_v49 = vpack.c.bf16 %v65_v45, %v58_v44  ;;  %v5347_v53 = vld [vmem:[#allocation2 + $0x404] ss:$16 sps:$4 sm:$0xff]   ;;  %v120_v44 = vld [vmem:[%s6557_s0 + $0x208] sm:$0xff] }
  0x80   :  { %1573 = vmatprep.subr.bf16.mxu0 %v5293_v54  ;;  %2025 = vmatprep.subr.bf16.mxu1 %v5296_v55  ;;  %v5350_v54 = vld [vmem:[#allocation2 + $0x40c] ss:$16 sps:$4 sm:$0xff]   ;;  %v5345_v55 = vld [vmem:[#allocation2 + $0x400] ss:$16 sps:$4 sm:$0xff]   ;;  %v5395_v45 = vld [vmem:[#allocation2 + $0x504] ss:$16 sps:$4 sm:$0xff]  }
  0x81   :  { %1518 = vmatprep.mubr.bf16.mxu0 %v196_v58  ;;  %1970 = vmatprep.mubr.bf16.mxu1 %v196_v58  ;;  %v79_v58 = vld [vmem:[%s6557_s0 + $0xc0] sm:$0xff] }
  0x83   :  { %1574 = vmatpush1.bf16.msra.mxu0 %v5291_v56  ;;  %2026 = vmatpush1.bf16.msra.mxu1 %v5294_v57  ;;  %v169_v56 = vpack.c.bf16 %v64_v52, %v57_v51  ;;  %v72_v57 = vld [vmem:[%s6557_s0 + $0x88] sm:$0xff]  ;;  %v5401_v52 = vld [vmem:[#allocation2 + $0x524] ss:$16 sps:$4 sm:$0xff]  }
  0x84   :  { %1575 = vmatprep.subr.bf16.mxu0 %v5299_v61  ;;  %2027 = vmatprep.subr.bf16.mxu1 %v5302_v62  ;;  %v5356_v61 = vld [vmem:[#allocation2 + $0x42c] ss:$16 sps:$4 sm:$0xff]   ;;  %v5351_v62 = vld [vmem:[#allocation2 + $0x420] ss:$16 sps:$4 sm:$0xff]   ;;  %v177_v0 = vpack.c.bf16 %v79_v58, %v72_v57  ;;  %v5396_v51 = vld [vmem:[#allocation2 + $0x508] ss:$16 sps:$4 sm:$0xff]  }
  0x85   :  { %v127_v57 = vld [vmem:[%s6557_s0 + $0x240] sm:$0xff]  ;;  %v134_v58 = vld [vmem:[%s6557_s0 + $0x278] sm:$0xff] }
  0x86   :  { %1519 = vmatmul.mubr.bf16.gmra.mrb[16].mxu0 %v195_v63  ;;  %1971 = vmatmul.mubr.bf16.gmra.mrb[16].mxu1 %v195_v63  ;;  %v5354_v63 = vld [vmem:[#allocation2 + $0x428] ss:$16 sps:$4 sm:$0xff]  }
  0x87   :  { %1576 = vmatpush1.bf16.msra.mxu0 %v5297_v2  ;;  %2028 = vmatpush1.bf16.msra.mxu1 %v5300_v3  ;;  %v78_v2 = vld [vmem:[%s6557_s0 + $0xb8] sm:$0xff]  ;;  %v5359_v3 = vld [vmem:[#allocation2 + $0x444] ss:$16 sps:$4 sm:$0xff]  }
  0x88   :  { %1577 = vmatprep.subr.bf16.mxu0 %v5305_v4  ;;  %2029 = vmatprep.subr.bf16.mxu1 %v5308_v5  ;;  %v5362_v4 = vld [vmem:[#allocation2 + $0x44c] ss:$16 sps:$4 sm:$0xff]   ;;  %v176_v5 = vpack.c.bf16 %v78_v2, %v71_v1  ;;  %v204_v1 = vpack.c.bf16 %v134_v58, %v127_v57  ;;  %v5413_v2 = vld [vmem:[#allocation2 + $0x564] ss:$16 sps:$4 sm:$0xff]  }
  0x89   :  { %1528 = vmatprep.mubr.bf16.mxu0 %v203_v8  ;;  %1980 = vmatprep.mubr.bf16.mxu1 %v203_v8  ;;  %v5357_v8 = vld [vmem:[#allocation2 + $0x440] ss:$16 sps:$4 sm:$0xff]  }
  0x8b   :  { %1578 = vmatpush1.bf16.msra.mxu0 %v5303_v6  ;;  %2030 = vmatpush1.bf16.msra.mxu1 %v5306_v7  ;;  %v86_v6 = vld [vmem:[%s6557_s0 + $0xf8] sm:$0xff]  ;;  %v93_v7 = vld [vmem:[%s6557_s0 + $0x130] sm:$0xff] }
  0x8c   :  { %1579 = vmatprep.subr.bf16.mxu0 %v5311_v11  ;;  %2031 = vmatprep.subr.bf16.mxu1 %v5314_v12  ;;  %v5368_v11 = vld [vmem:[#allocation2 + $0x46c] ss:$16 sps:$4 sm:$0xff]   ;;  %v5363_v12 = vld [vmem:[#allocation2 + $0x460] ss:$16 sps:$4 sm:$0xff]  }
  0x8e   :  { %1529 = vmatmul.mubr.bf16.gmra.mrb[20].mxu0 %v202_v14  ;;  %1981 = vmatmul.mubr.bf16.gmra.mrb[20].mxu1 %v202_v14  ;;  %v184_v14 = vpack.c.bf16 %v93_v7, %v86_v6  ;;  %v141_v7 = vld [vmem:[%s6557_s0 + $0x2b0] sm:$0xff] }
  0x8f   :  { %1580 = vmatpush1.bf16.msra.mxu0 %v5309_v13  ;;  %2032 = vmatpush1.bf16.msra.mxu1 %v5312_v15  ;;  %v5366_v13 = vld [vmem:[#allocation2 + $0x468] ss:$16 sps:$4 sm:$0xff]   ;;  %v85_v15 = vld [vmem:[%s6557_s0 + $0xf0] sm:$0xff] }
  0x90   :  { %1581 = vmatprep.subr.bf16.mxu0 %v5317_v18  ;;  %2033 = vmatprep.subr.bf16.mxu1 %v5320_v19  ;;  %v5374_v18 = vld [vmem:[#allocation2 + $0x48c] ss:$16 sps:$4 sm:$0xff]   ;;  %v5369_v19 = vld [vmem:[#allocation2 + $0x480] ss:$16 sps:$4 sm:$0xff]  }
  0x91   :  { %1538 = vmatprep.mubr.bf16.mxu0 %v210_v21  ;;  %1990 = vmatprep.mubr.bf16.mxu1 %v210_v21  ;;  %v5372_v21 = vld [vmem:[#allocation2 + $0x488] ss:$16 sps:$4 sm:$0xff]  }
  0x93   :  { %1582 = vmatpush1.bf16.msra.mxu0 %v5315_v20  ;;  %2034 = vmatpush1.bf16.msra.mxu1 %v5318_v22  ;;  %v183_v20 = vpack.c.bf16 %v92_v16, %v85_v15  ;;  %v100_v22 = vld [vmem:[%s6557_s0 + $0x168] sm:$0xff]  ;;  %v5425_v16 = vld [vmem:[#allocation2 + $0x5a4] ss:$16 sps:$4 sm:$0xff]  }
  0x94   :  { %1583 = vmatprep.subr.bf16.mxu0 %v5323_v25  ;;  %2035 = vmatprep.subr.bf16.mxu1 %v5326_v26  ;;  %v5380_v25 = vld [vmem:[#allocation2 + $0x4ac] ss:$16 sps:$4 sm:$0xff]   ;;  %v5375_v26 = vld [vmem:[#allocation2 + $0x4a0] ss:$16 sps:$4 sm:$0xff]  }
  0x96   :  { %1539 = vmatmul.mubr.bf16.gmra.mrb[24].mxu0 %v209_v29  ;;  %1991 = vmatmul.mubr.bf16.gmra.mrb[24].mxu1 %v209_v29  ;;  %v99_v29 = vld [vmem:[%s6557_s0 + $0x160] sm:$0xff] }
  0x97   :  { %1584 = vmatpush1.bf16.msra.mxu0 %v5321_v27  ;;  %2036 = vmatpush1.bf16.msra.mxu1 %v5324_v28  ;;  %v191_v27 = vpack.c.bf16 %v107_v23, %v100_v22  ;;  %v5378_v28 = vld [vmem:[#allocation2 + $0x4a8] ss:$16 sps:$4 sm:$0xff]   ;;  %v5431_v23 = vld [vmem:[#allocation2 + $0x5c4] ss:$16 sps:$4 sm:$0xff]  }
  0x98   :  { %1585 = vmatprep.subr.bf16.mxu0 %v5329_v32  ;;  %2037 = vmatprep.subr.bf16.mxu1 %v5332_v33  ;;  %v5386_v32 = vld [vmem:[#allocation2 + $0x4cc] ss:$16 sps:$4 sm:$0xff]   ;;  %v190_v33 = vpack.c.bf16 %v106_v30, %v99_v29  ;;  %v5437_v30 = vld [vmem:[#allocation2 + $0x5e4] ss:$16 sps:$4 sm:$0xff]  }
  0x99   :  { %1548 = vmatprep.mubr.bf16.mxu0 %v217_v34  ;;  %2000 = vmatprep.mubr.bf16.mxu1 %v217_v34  ;;  %v114_v34 = vld [vmem:[%s6557_s0 + $0x1d8] sm:$0xff] }
  0x9a   :  { %v162_v22 = vld [vmem:[%s6557_s0 + $0x358] sm:$0xff] }
  0x9b   :  { %1586 = vmatpush1.bf16.msra.mxu0 %v5327_v35  ;;  %2038 = vmatpush1.bf16.msra.mxu1 %v5330_v36  ;;  %v121_v35 = vld [vmem:[%s6557_s0 + $0x210] sm:$0xff] }
  0x9c   :  { %1587 = vmatprep.subr.bf16.mxu0 %v5335_v39  ;;  %2039 = vmatprep.subr.bf16.mxu1 %v5338_v40  ;;  %v5381_v36 = vld [vmem:[#allocation2 + $0x4c0] ss:$16 sps:$4 sm:$0xff]   ;;  %v5392_v39 = vld [vmem:[#allocation2 + $0x4ec] ss:$16 sps:$4 sm:$0xff]   ;;  %v198_v40 = vpack.c.bf16 %v121_v35, %v114_v34  ;;  %v5438_v34 = vld [vmem:[#allocation2 + $0x5e8] ss:$16 sps:$4 sm:$0xff]  }
  0x9d   :  { %v59_v35 = vld [vmem:[%s6557_s0 + $0x20] sm:$0xff] }
  0x9e   :  { %1549 = vmatmul.mubr.bf16.gmra.mrb[28].mxu0 %v216_v43  ;;  %2001 = vmatmul.mubr.bf16.gmra.mrb[28].mxu1 %v216_v43  ;;  %v113_v43 = vld [vmem:[%s6557_s0 + $0x1d0] sm:$0xff] }
  0x9f   :  { %1588 = vmatpush1.bf16.msra.mxu0 %v5333_v41  ;;  %2040 = vmatpush1.bf16.msra.mxu1 %v5336_v42  ;;  %v5387_v41 = vld [vmem:[#allocation2 + $0x4e0] ss:$16 sps:$4 sm:$0xff]   ;;  %v5390_v42 = vld [vmem:[#allocation2 + $0x4e8] ss:$16 sps:$4 sm:$0xff]  }
  0xa0   :  { %1589 = vmatprep.subr.bf16.mxu0 %v5341_v46  ;;  %2041 = vmatprep.subr.bf16.mxu1 %v5344_v47  ;;  %v5398_v46 = vld [vmem:[#allocation2 + $0x50c] ss:$16 sps:$4 sm:$0xff]   ;;  %v197_v47 = vpack.c.bf16 %v120_v44, %v113_v43  ;;  %v5444_v44 = vld [vmem:[#allocation2 + $0x608] ss:$16 sps:$4 sm:$0xff]  }
  0xa1   :  { %1591 = vmatprep.mubr.bf16.mxu0 %v170_v49  ;;  %2043 = vmatprep.mubr.bf16.mxu1 %v170_v49  ;;  %v135_v49 = vld [vmem:[%s6557_s0 + $0x280] sm:$0xff] }
  0xa3   :  { %1590 = vmatpush1.bf16.msra.mxu0 %v5339_v48  ;;  %2042 = vmatpush1.bf16.msra.mxu1 %v5342_v50  ;;  %v128_v48 = vld [vmem:[%s6557_s0 + $0x248] sm:$0xff]  ;;  %v5393_v50 = vld [vmem:[#allocation2 + $0x500] ss:$16 sps:$4 sm:$0xff]  }
  0xa4   :  { %1672 = vmatprep.subr.bf16.mxu0 %v5347_v53  ;;  %2124 = vmatprep.subr.bf16.mxu1 %v5350_v54  ;;  %v5404_v53 = vld [vmem:[#allocation2 + $0x52c] ss:$16 sps:$4 sm:$0xff]   ;;  %v205_v54 = vpack.c.bf16 %v135_v49, %v128_v48 }
  0xa5   :  { %v80_v48 = vld [vmem:[%s6557_s0 + $0xc8] sm:$0xff] }
  0xa6   :  { %1592 = vmatmul.mubr.bf16.vlgmr.msra.gmra.mrb[0].mxu0 %v169_v56  ;;  %2044 = vmatmul.mubr.bf16.vlgmr.msra.gmra.mrb[0].mxu1 %v169_v56  ;;  %v5402_v56 = vld [vmem:[#allocation2 + $0x528] ss:$16 sps:$4 sm:$0xff]  }
  0xa7   :  { %1673 = vmatpush1.bf16.msra.mxu0 %v5345_v55  ;;  %2125 = vmatpush1.bf16.msra.mxu1 %v5348_v59  ;;  %v5399_v55 = vld [vmem:[#allocation2 + $0x520] ss:$16 sps:$4 sm:$0xff]   ;;  %v5407_v59 = vld [vmem:[#allocation2 + $0x544] ss:$16 sps:$4 sm:$0xff]   ;;  %v88_v49 = vld [vmem:[%s6557_s0 + $0x108] sm:$0xff] }
  0xa8   :  { %1674 = vmatprep.subr.bf16.mxu0 %v5353_v60  ;;  %2126 = vmatprep.subr.bf16.mxu1 %v5356_v61  ;;  %v5410_v60 = vld [vmem:[#allocation2 + $0x54c] ss:$16 sps:$4 sm:$0xff]   ;;  %v5405_v61 = vld [vmem:[#allocation2 + $0x540] ss:$16 sps:$4 sm:$0xff]  }
  0xa9   :  { %1601 = vmatprep.mubr.bf16.mxu0 %v177_v0  ;;  %2053 = vmatprep.mubr.bf16.mxu1 %v177_v0  ;;  %v149_v0 = vld [vmem:[%s6557_s0 + $0x2f0] sm:$0xff] }
  0xab   :  { %1675 = vmatpush1.bf16.msra.mxu0 %v5351_v62  ;;  %2127 = vmatpush1.bf16.msra.mxu1 %v5354_v63  ;;  %v5408_v62 = vld [vmem:[#allocation2 + $0x548] ss:$16 sps:$4 sm:$0xff]  }
  0xac   :  { %1676 = vmatprep.subr.bf16.mxu0 %v5359_v3  ;;  %2128 = vmatprep.subr.bf16.mxu1 %v5362_v4  ;;  %v142_v63 = vld [vmem:[%s6557_s0 + $0x2b8] sm:$0xff]  ;;  %v5411_v4 = vld [vmem:[#allocation2 + $0x560] ss:$16 sps:$4 sm:$0xff]  }
  0xad   :  { %v5416_v3 = vld [vmem:[#allocation2 + $0x56c] ss:$16 sps:$4 sm:$0xff]   ;;  %v212_v6 = vpack.c.bf16 %v149_v0, %v142_v63 }
  0xae   :  { %1602 = vmatmul.mubr.bf16.gmra.mrb[4].mxu0 %v176_v5  ;;  %2054 = vmatmul.mubr.bf16.gmra.mrb[4].mxu1 %v176_v5  ;;  %v5414_v5 = vld [vmem:[#allocation2 + $0x568] ss:$16 sps:$4 sm:$0xff]  }
  0xaf   :  { %1677 = vmatpush1.bf16.msra.mxu0 %v5357_v8  ;;  %2129 = vmatpush1.bf16.msra.mxu1 %v5360_v9  ;;  %v148_v8 = vld [vmem:[%s6557_s0 + $0x2e8] sm:$0xff]  ;;  %v5419_v9 = vld [vmem:[#allocation2 + $0x584] ss:$16 sps:$4 sm:$0xff]  }
  0xb0   :  { %1678 = vmatprep.subr.bf16.mxu0 %v5365_v10  ;;  %2130 = vmatprep.subr.bf16.mxu1 %v5368_v11  ;;  %v5422_v10 = vld [vmem:[#allocation2 + $0x58c] ss:$16 sps:$4 sm:$0xff]   ;;  %v211_v15 = vpack.c.bf16 %v148_v8, %v141_v7  ;;  %v129_v7 = vld [vmem:[%s6557_s0 + $0x250] sm:$0xff] }
  0xb1   :  { %1611 = vmatprep.mubr.bf16.mxu0 %v184_v14  ;;  %2063 = vmatprep.mubr.bf16.mxu1 %v184_v14  ;;  %v156_v11 = vld [vmem:[%s6557_s0 + $0x328] sm:$0xff] }
  0xb2   :  { %v5420_v14 = vld [vmem:[#allocation2 + $0x588] ss:$16 sps:$4 sm:$0xff]  }
  0xb3   :  { %1679 = vmatpush1.bf16.msra.mxu0 %v5363_v12  ;;  %2131 = vmatpush1.bf16.msra.mxu1 %v5366_v13  ;;  %v163_v12 = vld [vmem:[%s6557_s0 + $0x360] sm:$0xff]  ;;  %v136_v8 = vld [vmem:[%s6557_s0 + $0x288] sm:$0xff] }
  0xb4   :  { %1680 = vmatprep.subr.bf16.mxu0 %v5371_v17  ;;  %2132 = vmatprep.subr.bf16.mxu1 %v5374_v18  ;;  %v5417_v13 = vld [vmem:[#allocation2 + $0x580] ss:$16 sps:$4 sm:$0xff]   ;;  %v5428_v17 = vld [vmem:[#allocation2 + $0x5ac] ss:$16 sps:$4 sm:$0xff]  }
  0xb5   :  { %v5423_v18 = vld [vmem:[#allocation2 + $0x5a0] ss:$16 sps:$4 sm:$0xff]  }
  0xb6   :  { %1612 = vmatmul.mubr.bf16.gmra.mrb[8].mxu0 %v183_v20  ;;  %2064 = vmatmul.mubr.bf16.gmra.mrb[8].mxu1 %v183_v20  ;;  %v219_v20 = vpack.c.bf16 %v163_v12, %v156_v11  ;;  %v206_v11 = vpack.c.bf16 %v136_v8, %v129_v7  ;;  %v5498_v7 = vld [vmem:[#allocation4 + $0x108] ss:$16 sps:$4 sm:$0xff]   ;;  %v5503_v8 = vld [vmem:[#allocation4 + $0x124] ss:$16 sps:$4 sm:$0xff]  }
  0xb7   :  { %1681 = vmatpush1.bf16.msra.mxu0 %v5369_v19  ;;  %2133 = vmatpush1.bf16.msra.mxu1 %v5372_v21  ;;  %v5426_v19 = vld [vmem:[#allocation2 + $0x5a8] ss:$16 sps:$4 sm:$0xff]   ;;  %v155_v21 = vld [vmem:[%s6557_s0 + $0x320] sm:$0xff] }
  0xb8   :  { %1682 = vmatprep.subr.bf16.mxu0 %v5377_v24  ;;  %2134 = vmatprep.subr.bf16.mxu1 %v5380_v25  ;;  %v5434_v24 = vld [vmem:[#allocation2 + $0x5cc] ss:$16 sps:$4 sm:$0xff]   ;;  %v218_v29 = vpack.c.bf16 %v162_v22, %v155_v21  ;;  %v5723_v22 = vmov 0  }
  0xb9   :  { %1621 = vmatprep.mubr.bf16.mxu0 %v191_v27  ;;  %2073 = vmatprep.mubr.bf16.mxu1 %v191_v27  ;;  %v60_v25 = vld [vmem:[%s6557_s0 + $0x28] sm:$0xff]  ;;  %v5429_v27 = vld [vmem:[#allocation2 + $0x5c0] ss:$16 sps:$4 sm:$0xff]  }
  0xbb   :  { %1683 = vmatpush1.bf16.msra.mxu0 %v5375_v26  ;;  %2135 = vmatpush1.bf16.msra.mxu1 %v5378_v28  ;;  %v67_v26 = vld [vmem:[%s6557_s0 + $0x60] sm:$0xff]  ;;  %v5432_v28 = vld [vmem:[#allocation2 + $0x5c8] ss:$16 sps:$4 sm:$0xff]  }
  0xbc   :  { %1684 = vmatprep.subr.bf16.mxu0 %v5383_v31  ;;  %2136 = vmatprep.subr.bf16.mxu1 %v5386_v32  ;;  %v5440_v31 = vld [vmem:[#allocation2 + $0x5ec] ss:$16 sps:$4 sm:$0xff]   ;;  %v172_v32 = vpack.c.bf16 %v67_v26, %v60_v25  ;;  %v5447_v26 = vld [vmem:[#allocation4] ss:$16 sps:$4 sm:$0xff]  }
  0xbe   :  { %1622 = vmatmul.mubr.bf16.gmra.mrb[12].mxu0 %v190_v33  ;;  %2074 = vmatmul.mubr.bf16.gmra.mrb[12].mxu1 %v190_v33  ;;  %v5435_v33 = vld [vmem:[#allocation2 + $0x5e0] ss:$16 sps:$4 sm:$0xff]  }
  0xbf   :  { %1685 = vmatpush1.bf16.msra.mxu0 %v5381_v36  ;;  %2137 = vmatpush1.bf16.msra.mxu1 %v5384_v37  ;;  %v66_v36 = vld [vmem:[%s6557_s0 + $0x58] sm:$0xff]  ;;  %v5443_v37 = vld [vmem:[#allocation2 + $0x604] ss:$16 sps:$4 sm:$0xff]  }
  0xc0   :  { %1686 = vmatprep.subr.bf16.mxu0 %v5389_v38  ;;  %2138 = vmatprep.subr.bf16.mxu1 %v5392_v39  ;;  %v74_v38 = vld [vmem:[%s6557_s0 + $0x98] sm:$0xff]  ;;  %v81_v39 = vld [vmem:[%s6557_s0 + $0xd0] sm:$0xff] }
  0xc1   :  { %1631 = vmatprep.mubr.bf16.mxu0 %v198_v40  ;;  %2083 = vmatprep.mubr.bf16.mxu1 %v198_v40  ;;  %v5446_v40 = vld [vmem:[#allocation2 + $0x60c] ss:$16 sps:$4 sm:$0xff]   ;;  %v179_v43 = vpack.c.bf16 %v81_v39, %v74_v38  ;;  %v5462_v38 = vld [vmem:[#allocation4 + $0x48] ss:$16 sps:$4 sm:$0xff]   ;;  %v5467_v39 = vld [vmem:[#allocation4 + $0x64] ss:$16 sps:$4 sm:$0xff]  }
  0xc3   :  { %1687 = vmatpush1.bf16.msra.mxu0 %v5387_v41  ;;  %2139 = vmatpush1.bf16.msra.mxu1 %v5390_v42  ;;  %v171_v41 = vpack.c.bf16 %v66_v36, %v59_v35  ;;  %v5441_v42 = vld [vmem:[#allocation2 + $0x600] ss:$16 sps:$4 sm:$0xff]   ;;  %v5464_v35 = vld [vmem:[#allocation4 + $0x4c] ss:$16 sps:$4 sm:$0xff]  }
  0xc4   :  { %1688 = vmatprep.subr.bf16.mxu0 %v5395_v45  ;;  %2140 = vmatprep.subr.bf16.mxu1 %v5398_v46  ;;  %v5449_v45 = vld [vmem:[#allocation4 + $0x4] ss:$16 sps:$4 sm:$0xff]   ;;  %v5452_v46 = vld [vmem:[#allocation4 + $0xc] ss:$16 sps:$4 sm:$0xff]  }
  0xc6   :  { %1632 = vmatmul.mubr.bf16.gmra.mrb[16].mxu0 %v197_v47  ;;  %2084 = vmatmul.mubr.bf16.gmra.mrb[16].mxu1 %v197_v47  ;;  %v73_v47 = vld [vmem:[%s6557_s0 + $0x90] sm:$0xff] }
  0xc7   :  { %1689 = vmatpush1.bf16.msra.mxu0 %v5393_v50  ;;  %2141 = vmatpush1.bf16.msra.mxu1 %v5396_v51  ;;  %v95_v50 = vld [vmem:[%s6557_s0 + $0x140] sm:$0xff]  ;;  %v178_v51 = vpack.c.bf16 %v80_v48, %v73_v47 }
  0xc8   :  { %1690 = vmatprep.subr.bf16.mxu0 %v5401_v52  ;;  %2142 = vmatprep.subr.bf16.mxu1 %v5404_v53  ;;  %v186_v52 = vpack.c.bf16 %v95_v50, %v88_v49  ;;  %v87_v53 = vld [vmem:[%s6557_s0 + $0x100] sm:$0xff]  ;;  %v5474_v49 = vld [vmem:[#allocation4 + $0x88] ss:$16 sps:$4 sm:$0xff]  }
  0xc9   :  { %1641 = vmatprep.mubr.bf16.mxu0 %v205_v54  ;;  %2093 = vmatprep.mubr.bf16.mxu1 %v205_v54  ;;  %v94_v54 = vld [vmem:[%s6557_s0 + $0x138] sm:$0xff]  ;;  %v5471_v48 = vld [vmem:[#allocation4 + $0x80] ss:$16 sps:$4 sm:$0xff]   ;;  %v5479_v50 = vld [vmem:[#allocation4 + $0xa4] ss:$16 sps:$4 sm:$0xff]  }
  0xca   :  { %v185_v57 = vpack.c.bf16 %v94_v54, %v87_v53  ;;  %v110_v53 = vld [vmem:[%s6557_s0 + $0x1b8] sm:$0xff]  ;;  %v5477_v54 = vld [vmem:[#allocation4 + $0xa0] ss:$16 sps:$4 sm:$0xff]  }
  0xcb   :  { %1691 = vmatpush1.bf16.msra.mxu0 %v5399_v55  ;;  %2143 = vmatpush1.bf16.msra.mxu1 %v5402_v56  ;;  %v102_v55 = vld [vmem:[%s6557_s0 + $0x178] sm:$0xff]  ;;  %v109_v56 = vld [vmem:[%s6557_s0 + $0x1b0] sm:$0xff] }
  0xcc   :  { %1692 = vmatprep.subr.bf16.mxu0 %v5407_v59  ;;  %2144 = vmatprep.subr.bf16.mxu1 %v5410_v60  ;;  %v193_v58 = vpack.c.bf16 %v109_v56, %v102_v55  ;;  %v101_v59 = vld [vmem:[%s6557_s0 + $0x170] sm:$0xff]  ;;  %v108_v60 = vld [vmem:[%s6557_s0 + $0x1a8] sm:$0xff] }
  0xcd   :  { %v192_v63 = vpack.c.bf16 %v108_v60, %v101_v59  ;;  %v5480_v55 = vld [vmem:[#allocation4 + $0xa8] ss:$16 sps:$4 sm:$0xff]   ;;  %v5485_v56 = vld [vmem:[#allocation4 + $0xc4] ss:$16 sps:$4 sm:$0xff]   ;;  %v5483_v59 = vld [vmem:[#allocation4 + $0xc0] ss:$16 sps:$4 sm:$0xff]  }
  0xce   :  { %1642 = vmatmul.mubr.bf16.gmra.mrb[20].mxu0 %v204_v1  ;;  %2094 = vmatmul.mubr.bf16.gmra.mrb[20].mxu1 %v204_v1  ;;  %v115_v1 = vld [vmem:[%s6557_s0 + $0x1e0] sm:$0xff]  ;;  %v5486_v60 = vld [vmem:[#allocation4 + $0xc8] ss:$16 sps:$4 sm:$0xff]  }
  0xcf   :  { %1693 = vmatpush1.bf16.msra.mxu0 %v5405_v61  ;;  %2145 = vmatpush1.bf16.msra.mxu1 %v5408_v62  ;;  %v116_v61 = vld [vmem:[%s6557_s0 + $0x1e8] sm:$0xff]  ;;  %v123_v62 = vld [vmem:[%s6557_s0 + $0x220] sm:$0xff] }
  0xd0   :  { %1694 = vmatprep.subr.bf16.mxu0 %v5413_v2  ;;  %2146 = vmatprep.subr.bf16.mxu1 %v5416_v3  ;;  %v200_v0 = vpack.c.bf16 %v123_v62, %v116_v61  ;;  %v122_v2 = vld [vmem:[%s6557_s0 + $0x218] sm:$0xff]  ;;  %v5491_v61 = vld [vmem:[#allocation4 + $0xe4] ss:$16 sps:$4 sm:$0xff]  }
  0xd1   :  { %1651 = vmatprep.mubr.bf16.mxu0 %v212_v6  ;;  %2103 = vmatprep.mubr.bf16.mxu1 %v212_v6  ;;  %v130_v3 = vld [vmem:[%s6557_s0 + $0x258] sm:$0xff] }
  0xd2   :  { %v5494_v62 = vld [vmem:[#allocation4 + $0xec] ss:$16 sps:$4 sm:$0xff]  }
  0xd3   :  { %1695 = vmatpush1.bf16.msra.mxu0 %v5411_v4  ;;  %2147 = vmatpush1.bf16.msra.mxu1 %v5414_v5  ;;  %v137_v4 = vld [vmem:[%s6557_s0 + $0x290] sm:$0xff]  ;;  %v199_v5 = vpack.c.bf16 %v122_v2, %v115_v1  ;;  %v5492_v2 = vld [vmem:[#allocation4 + $0xe8] ss:$16 sps:$4 sm:$0xff]  }
  0xd4   :  { %1696 = vmatprep.subr.bf16.mxu0 %v5419_v9  ;;  %2148 = vmatprep.subr.bf16.mxu1 %v5422_v10  ;;  %v207_v6 = vpack.c.bf16 %v137_v4, %v130_v3  ;;  %v144_v9 = vld [vmem:[%s6557_s0 + $0x2c8] sm:$0xff]  ;;  %v151_v10 = vld [vmem:[%s6557_s0 + $0x300] sm:$0xff] }
  0xd5   :  { %v214_v12 = vpack.c.bf16 %v151_v10, %v144_v9  ;;  %v5489_v1 = vld [vmem:[#allocation4 + $0xe0] ss:$16 sps:$4 sm:$0xff]   ;;  %v5497_v3 = vld [vmem:[#allocation4 + $0x104] ss:$16 sps:$4 sm:$0xff]   ;;  %v5500_v4 = vld [vmem:[#allocation4 + $0x10c] ss:$16 sps:$4 sm:$0xff]  }
  0xd6   :  { %1652 = vmatmul.mubr.bf16.gmra.mrb[24].mxu0 %v211_v15  ;;  %2104 = vmatmul.mubr.bf16.gmra.mrb[24].mxu1 %v211_v15  ;;  %v158_v15 = vld [vmem:[%s6557_s0 + $0x338] sm:$0xff]  ;;  %v131_v10 = vld [vmem:[%s6557_s0 + $0x260] sm:$0xff] }
  0xd7   :  { %1697 = vmatpush1.bf16.msra.mxu0 %v5417_v13  ;;  %2149 = vmatpush1.bf16.msra.mxu1 %v5420_v14  ;;  %v143_v13 = vld [vmem:[%s6557_s0 + $0x2c0] sm:$0xff]  ;;  %v150_v14 = vld [vmem:[%s6557_s0 + $0x2f8] sm:$0xff] }
  0xd8   :  { %1698 = vmatprep.subr.bf16.mxu0 %v5425_v16  ;;  %2150 = vmatprep.subr.bf16.mxu1 %v5428_v17  ;;  %v165_v16 = vld [vmem:[%s6557_s0 + $0x370] sm:$0xff]  ;;  %v213_v17 = vpack.c.bf16 %v150_v14, %v143_v13  ;;  %v5506_v9 = vld [vmem:[#allocation4 + $0x12c] ss:$16 sps:$4 sm:$0xff]   ;;  %v5504_v13 = vld [vmem:[#allocation4 + $0x128] ss:$16 sps:$4 sm:$0xff]  }
  0xd9   :  { %1661 = vmatprep.mubr.bf16.mxu0 %v219_v20  ;;  %2113 = vmatprep.mubr.bf16.mxu1 %v219_v20  ;;  %v164_v20 = vld [vmem:[%s6557_s0 + $0x368] sm:$0xff]  ;;  %v5509_v14 = vld [vmem:[#allocation4 + $0x144] ss:$16 sps:$4 sm:$0xff]  }
  0xdb   :  { %1699 = vmatpush1.bf16.msra.mxu0 %v5423_v18  ;;  %2151 = vmatpush1.bf16.msra.mxu1 %v5426_v19  ;;  %v221_v18 = vpack.c.bf16 %v165_v16, %v158_v15  ;;  %v157_v19 = vld [vmem:[%s6557_s0 + $0x330] sm:$0xff]  ;;  %v5512_v15 = vld [vmem:[#allocation4 + $0x14c] ss:$16 sps:$4 sm:$0xff]  }
  0xdc   :  { %1700 = vmatprep.subr.bf16.mxu0 %v5431_v23  ;;  %2152 = vmatprep.subr.bf16.mxu1 %v5434_v24  ;;  %v220_v21 = vpack.c.bf16 %v164_v20, %v157_v19  ;;  %v61_v23 = vld [vmem:[%s6557_s0 + $0x30] sm:$0xff]  ;;  %v68_v24 = vld [vmem:[%s6557_s0 + $0x68] sm:$0xff] }
  0xdd   :  { %v173_v25 = vpack.c.bf16 %v68_v24, %v61_v23  ;;  %v5515_v19 = vld [vmem:[#allocation4 + $0x164] ss:$16 sps:$4 sm:$0xff]   ;;  %v5518_v20 = vld [vmem:[#allocation4 + $0x16c] ss:$16 sps:$4 sm:$0xff]   ;;  %v5513_v24 = vld [vmem:[#allocation4 + $0x160] ss:$16 sps:$4 sm:$0xff]  }
  0xde   :  { %1662 = vmatmul.mubr.bf16.gmra.mrb[28].mxu0 %v218_v29  ;;  %2114 = vmatmul.mubr.bf16.gmra.mrb[28].mxu1 %v218_v29  ;;  %v5458_v29 = vld [vmem:[#allocation4 + $0x2c] ss:$16 sps:$4 sm:$0xff]  }
  0xdf   :  { %1701 = vmatpush1.bf16.msra.mxu0 %v5429_v27  ;;  %2153 = vmatpush1.bf16.msra.mxu1 %v5432_v28  ;;  %v5450_v27 = vld [vmem:[#allocation4 + $0x8] ss:$16 sps:$4 sm:$0xff]   ;;  %v5455_v28 = vld [vmem:[#allocation4 + $0x24] ss:$16 sps:$4 sm:$0xff]  }
  0xe0   :  { %1702 = vmatprep.subr.bf16.mxu0 %v5437_v30  ;;  %2154 = vmatprep.subr.bf16.mxu1 %v5440_v31  ;;  %v75_v30 = vld [vmem:[%s6557_s0 + $0xa0] sm:$0xff]  ;;  %v82_v31 = vld [vmem:[%s6557_s0 + $0xd8] sm:$0xff]  ;;  %v152_v23 = vld [vmem:[%s6557_s0 + $0x308] sm:$0xff] }
  0xe1   :  { %1704 = vmatprep.mubr.bf16.mxu0 %v172_v32  ;;  %2156 = vmatprep.mubr.bf16.mxu1 %v172_v32  ;;  %v5453_v32 = vld [vmem:[#allocation4 + $0x20] ss:$16 sps:$4 sm:$0xff]   ;;  %v180_v36 = vpack.c.bf16 %v82_v31, %v75_v30  ;;  %v5522_v30 = vld [vmem:[#allocation4 + $0x188] ss:$16 sps:$4 sm:$0xff]   ;;  %v5527_v31 = vld [vmem:[#allocation4 + $0x1a4] ss:$16 sps:$4 sm:$0xff]  }
  0xe3   :  { %1703 = vmatpush1.bf16.msra.mxu0 %v5435_v33  ;;  %2155 = vmatpush1.bf16.msra.mxu1 %v5438_v34  ;;  %v5456_v33 = vld [vmem:[#allocation4 + $0x28] ss:$16 sps:$4 sm:$0xff]   ;;  %v5461_v34 = vld [vmem:[#allocation4 + $0x44] ss:$16 sps:$4 sm:$0xff]  }
  0xe4   :  { %1785 = vmatprep.subr.bf16.mxu0 %v5443_v37  ;;  %2237 = vmatprep.subr.bf16.mxu1 %v5446_v40  ;;  %v5459_v37 = vld [vmem:[#allocation4 + $0x40] ss:$16 sps:$4 sm:$0xff]   ;;  %v5470_v40 = vld [vmem:[#allocation4 + $0x6c] ss:$16 sps:$4 sm:$0xff]  }
  0xe6   :  { %1705 = vmatmul.mubr.bf16.vlgmr.msra.gmra.mrb[0].mxu0 %v171_v41  ;;  %2157 = vmatmul.mubr.bf16.vlgmr.msra.gmra.mrb[0].mxu1 %v171_v41  ;;  %v89_v41 = vld [vmem:[%s6557_s0 + $0x110] sm:$0xff] }
  0xe7   :  { %1786 = vmatpush1.bf16.msra.mxu0 %v5441_v42  ;;  %1714 = vmatprep.mubr.bf16.mxu0 %v179_v43  ;;  %v96_v42 = vld [vmem:[%s6557_s0 + $0x148] sm:$0xff] }
  0xe8   :  { %2166 = vmatprep.mubr.bf16.mxu1 %v179_v43  ;;  %2238 = vmatpush1.bf16.msra.mxu1 %v5444_v44  ;;  %v5465_v43 = vld [vmem:[#allocation4 + $0x60] ss:$16 sps:$4 sm:$0xff]   ;;  %v5468_v44 = vld [vmem:[#allocation4 + $0x68] ss:$16 sps:$4 sm:$0xff]   ;;  %v187_v47 = vpack.c.bf16 %v96_v42, %v89_v41  ;;  %v5539_v41 = vld [vmem:[#allocation4 + $0x1e4] ss:$16 sps:$4 sm:$0xff]  }
  0xe9   :  { %3236 = vmatprep.subr.bf16.mxu0 %v5449_v45  ;;  %3462 = vmatprep.subr.bf16.mxu1 %v5452_v46  ;;  %v5473_v45 = vld [vmem:[#allocation4 + $0x84] ss:$16 sps:$4 sm:$0xff]   ;;  %v5476_v46 = vld [vmem:[#allocation4 + $0x8c] ss:$16 sps:$4 sm:$0xff]  }
  0xea   :  { %v5542_v42 = vld [vmem:[#allocation4 + $0x1ec] ss:$16 sps:$4 sm:$0xff]  }
  0xee   :  { %1715 = vmatmul.mubr.bf16.gmra.mrb[4].mxu0 %v178_v51  ;;  %2167 = vmatmul.mubr.bf16.gmra.mrb[4].mxu1 %v178_v51  ;;  %v5482_v51 = vld [vmem:[#allocation4 + $0xac] ss:$16 sps:$4 sm:$0xff]  }
  0xef   :  { %1724 = vmatprep.mubr.bf16.mxu0 %v186_v52  ;;  %2176 = vmatprep.mubr.bf16.mxu1 %v186_v52  ;;  %v103_v52 = vld [vmem:[%s6557_s0 + $0x180] sm:$0xff] }
  0xf6   :  { %1725 = vmatmul.mubr.bf16.gmra.mrb[8].mxu0 %v185_v57  ;;  %2177 = vmatmul.mubr.bf16.gmra.mrb[8].mxu1 %v185_v57  ;;  %v5488_v57 = vld [vmem:[#allocation4 + $0xcc] ss:$16 sps:$4 sm:$0xff]  }
  0xf7   :  { %1734 = vmatprep.mubr.bf16.mxu0 %v193_v58  ;;  %2186 = vmatprep.mubr.bf16.mxu1 %v193_v58  ;;  %v194_v58 = vpack.c.bf16 %v110_v53, %v103_v52 }
  0xfe   :  { %1735 = vmatmul.mubr.bf16.gmra.mrb[12].mxu0 %v192_v63  ;;  %2187 = vmatmul.mubr.bf16.gmra.mrb[12].mxu1 %v192_v63  ;;  %v117_v63 = vld [vmem:[%s6557_s0 + $0x1f0] sm:$0xff] }
  0xff   :  { %1744 = vmatprep.mubr.bf16.mxu0 %v200_v0  ;;  %2196 = vmatprep.mubr.bf16.mxu1 %v200_v0  ;;  %v124_v0 = vld [vmem:[%s6557_s0 + $0x228] sm:$0xff] }
 0x106   :  { %1745 = vmatmul.mubr.bf16.gmra.mrb[16].mxu0 %v199_v5  ;;  %2197 = vmatmul.mubr.bf16.gmra.mrb[16].mxu1 %v199_v5  ;;  %v201_v5 = vpack.c.bf16 %v124_v0, %v117_v63 }
 0x107   :  { %1754 = vmatprep.mubr.bf16.mxu0 %v207_v6  ;;  %2206 = vmatprep.mubr.bf16.mxu1 %v207_v6  ;;  %v5495_v6 = vld [vmem:[#allocation4 + $0x100] ss:$16 sps:$4 sm:$0xff]  }
 0x10e   :  { %1755 = vmatmul.mubr.bf16.gmra.mrb[20].mxu0 %v206_v11  ;;  %2207 = vmatmul.mubr.bf16.gmra.mrb[20].mxu1 %v206_v11  ;;  %v138_v11 = vld [vmem:[%s6557_s0 + $0x298] sm:$0xff] }
 0x10f   :  { %1764 = vmatprep.mubr.bf16.mxu0 %v214_v12  ;;  %2216 = vmatprep.mubr.bf16.mxu1 %v214_v12  ;;  %v5501_v12 = vld [vmem:[#allocation4 + $0x120] ss:$16 sps:$4 sm:$0xff]   ;;  %v208_v16 = vpack.c.bf16 %v138_v11, %v131_v10 }
 0x116   :  { %1765 = vmatmul.mubr.bf16.gmra.mrb[24].mxu0 %v213_v17  ;;  %2217 = vmatmul.mubr.bf16.gmra.mrb[24].mxu1 %v213_v17  ;;  %v5507_v17 = vld [vmem:[#allocation4 + $0x140] ss:$16 sps:$4 sm:$0xff]  }
 0x117   :  { %1774 = vmatprep.mubr.bf16.mxu0 %v221_v18  ;;  %2226 = vmatprep.mubr.bf16.mxu1 %v221_v18  ;;  %v5510_v18 = vld [vmem:[#allocation4 + $0x148] ss:$16 sps:$4 sm:$0xff]  }
 0x11e   :  { %1775 = vmatmul.mubr.bf16.gmra.mrb[28].mxu0 %v220_v21  ;;  %2227 = vmatmul.mubr.bf16.gmra.mrb[28].mxu1 %v220_v21  ;;  %v145_v21 = vld [vmem:[%s6557_s0 + $0x2d0] sm:$0xff] }
 0x11f   :  { %1817 = vmatprep.mubr.bf16.mxu0 %v5723_v22  ;;  %2269 = vmatprep.mubr.bf16.mxu1 %v5723_v22 }
 0x126   :  { %4459 = vmatmul.mubr.msk.bf16.vlgmr.msra.gmra.mrb[0].mxu0 %vm1421_vm0, %v173_v25  ;;  %4467 = vmatmul.mubr.msk.bf16.vlgmr.msra.gmra.mrb[0].mxu1 %vm1421_vm0, %v173_v25  ;;  %v5516_v25 = vld [vmem:[#allocation4 + $0x168] ss:$16 sps:$4 sm:$0xff]  }
 0x127   :  { %1827 = vmatprep.mubr.bf16.mxu0 %v5723_v22  ;;  %2279 = vmatprep.mubr.bf16.mxu1 %v5723_v22 }
 0x128   :  { %3237 = vmatpush1.bf16.msra.mxu0 %v5447_v26  ;;  %3463 = vmatpush1.bf16.msra.mxu1 %v5450_v27  ;;  %v5521_v26 = vld [vmem:[#allocation4 + $0x184] ss:$16 sps:$4 sm:$0xff]   ;;  %v5524_v27 = vld [vmem:[#allocation4 + $0x18c] ss:$16 sps:$4 sm:$0xff]  }
 0x129   :  { %3238 = vmatprep.subr.bf16.mxu0 %v5455_v28  ;;  %3464 = vmatprep.subr.bf16.mxu1 %v5458_v29  ;;  %v215_v28 = vpack.c.bf16 %v152_v23, %v145_v21  ;;  %v5519_v29 = vld [vmem:[#allocation4 + $0x180] ss:$16 sps:$4 sm:$0xff]  }
 0x12c   :  { %3239 = vmatpush1.bf16.msra.mxu0 %v5453_v32  ;;  %3465 = vmatpush1.bf16.msra.mxu1 %v5456_v33  ;;  %v5530_v32 = vld [vmem:[#allocation4 + $0x1ac] ss:$16 sps:$4 sm:$0xff]   ;;  %v159_v33 = vld [vmem:[%s6557_s0 + $0x340] sm:$0xff] }
 0x12d   :  { %3240 = vmatprep.subr.bf16.mxu0 %v5461_v34  ;;  %3466 = vmatprep.subr.bf16.mxu1 %v5464_v35  ;;  %v166_v34 = vld [vmem:[%s6557_s0 + $0x378] sm:$0xff]  ;;  %v5525_v35 = vld [vmem:[#allocation4 + $0x1a0] ss:$16 sps:$4 sm:$0xff]  }
 0x12e   :  { %4460 = vmatmul.mubr.msk.bf16.gmra.mrb[4].mxu0 %vm1421_vm0, %v180_v36  ;;  %4468 = vmatmul.mubr.msk.bf16.gmra.mrb[4].mxu1 %vm1421_vm0, %v180_v36  ;;  %v5528_v36 = vld [vmem:[#allocation4 + $0x1a8] ss:$16 sps:$4 sm:$0xff]  }
 0x12f   :  { %1837 = vmatprep.mubr.bf16.mxu0 %v5723_v22  ;;  %2289 = vmatprep.mubr.bf16.mxu1 %v5723_v22 }
 0x130   :  { %3241 = vmatpush1.bf16.msra.mxu0 %v5459_v37  ;;  %3467 = vmatpush1.bf16.msra.mxu1 %v5462_v38  ;;  %v222_v37 = vpack.c.bf16 %v166_v34, %v159_v33  ;;  %v5536_v38 = vld [vmem:[#allocation4 + $0x1cc] ss:$16 sps:$4 sm:$0xff]  }
 0x131   :  { %3242 = vmatprep.subr.bf16.mxu0 %v5467_v39  ;;  %3468 = vmatprep.subr.bf16.mxu1 %v5470_v40  ;;  %v5531_v39 = vld [vmem:[#allocation4 + $0x1c0] ss:$16 sps:$4 sm:$0xff]   ;;  %v5534_v40 = vld [vmem:[#allocation4 + $0x1c8] ss:$16 sps:$4 sm:$0xff]  }
 0x134   :  { %3243 = vmatpush1.bf16.msra.mxu0 %v5465_v43  ;;  %3469 = vmatpush1.bf16.msra.mxu1 %v5468_v44  ;;  %v5537_v43 = vld [vmem:[#allocation4 + $0x1e0] ss:$16 sps:$4 sm:$0xff]   ;;  %v5540_v44 = vld [vmem:[#allocation4 + $0x1e8] ss:$16 sps:$4 sm:$0xff]  }
 0x135   :  { %3244 = vmatprep.subr.bf16.mxu0 %v5473_v45  ;;  %3470 = vmatprep.subr.bf16.mxu1 %v5476_v46  ;;  %v5545_v45 = vld [vmem:[#allocation4 + $0x204] ss:$16 sps:$4 sm:$0xff]   ;;  %v5548_v46 = vld [vmem:[#allocation4 + $0x20c] ss:$16 sps:$4 sm:$0xff]  }
 0x136   :  { %4461 = vmatmul.mubr.msk.bf16.gmra.mrb[8].mxu0 %vm1421_vm0, %v187_v47  ;;  %4469 = vmatmul.mubr.msk.bf16.gmra.mrb[8].mxu1 %vm1421_vm0, %v187_v47  ;;  %v421_v47 = vlaneseq }
 0x137   :  { %1847 = vmatprep.mubr.bf16.mxu0 %v5723_v22  ;;  %2299 = vmatprep.mubr.bf16.mxu1 %v5723_v22 }
 0x138   :  { %3245 = vmatpush1.bf16.msra.mxu0 %v5471_v48  ;;  %3471 = vmatpush1.bf16.msra.mxu1 %v5474_v49  ;;  %v6156_v48 = vshrl.u32 %v421_v47, 7 }
 0x139   :  { %3246 = vmatprep.subr.bf16.mxu0 %v5479_v50  ;;  %3472 = vmatprep.subr.bf16.mxu1 %v5482_v51  ;;  %v419_v51 = vld [vmem:[%s6559_s2] sm:$0xf] }
 0x13a   :  { %v423_v49 = vsub.s32 0, %v6156_v48  ;;  %v431_v50 = vsub.s32 2, %v6156_v48  ;;  %v427_v52 = vsub.s32 1, %v6156_v48  ;;  %v435_v53 = vsub.s32 3, %v6156_v48 }
 0x13c   :  { %3247 = vmatpush1.bf16.msra.mxu0 %v5477_v54  ;;  %3473 = vmatpush1.bf16.msra.mxu1 %v5480_v55  ;;  %v6167_v54 = vrot.slane %v419_v51, %v423_v49  ;;  %v6171_v55 = vrot.slane %v419_v51, %v431_v50 }
 0x13d   :  { %3248 = vmatprep.subr.bf16.mxu0 %v5485_v56  ;;  %3474 = vmatprep.subr.bf16.mxu1 %v5488_v57  ;;  %v6175_v56 = vrot.slane %v419_v51, %v427_v52  ;;  %v6179_v57 = vrot.slane %v419_v51, %v435_v53 }
 0x13e   :  { %4462 = vmatmul.mubr.msk.bf16.gmra.mrb[12].mxu0 %vm1421_vm0, %v194_v58  ;;  %4470 = vmatmul.mubr.msk.bf16.gmra.mrb[12].mxu1 %vm1421_vm0, %v194_v58 }
 0x13f   :  { %1857 = vmatprep.mubr.bf16.mxu0 %v5723_v22  ;;  %2309 = vmatprep.mubr.bf16.mxu1 %v5723_v22 }
 0x140   :  { %3249 = vmatpush1.bf16.msra.mxu0 %v5483_v59  ;;  %3475 = vmatpush1.bf16.msra.mxu1 %v5486_v60 }
 0x141   :  { %3250 = vmatprep.subr.bf16.mxu0 %v5491_v61  ;;  %3476 = vmatprep.subr.bf16.mxu1 %v5494_v62 }
 0x144   :  { %3251 = vmatpush1.bf16.msra.mxu0 %v5489_v1  ;;  %3477 = vmatpush1.bf16.msra.mxu1 %v5492_v2 }
 0x145   :  { %3252 = vmatprep.subr.bf16.mxu0 %v5497_v3  ;;  %3478 = vmatprep.subr.bf16.mxu1 %v5500_v4 }
 0x146   :  { %4463 = vmatmul.mubr.msk.bf16.gmra.mrb[16].mxu0 %vm1421_vm0, %v201_v5  ;;  %4471 = vmatmul.mubr.msk.bf16.gmra.mrb[16].mxu1 %vm1421_vm0, %v201_v5 }
 0x147   :  { %1867 = vmatprep.mubr.bf16.mxu0 %v5723_v22  ;;  %2319 = vmatprep.mubr.bf16.mxu1 %v5723_v22 }
 0x148   :  { %3253 = vmatpush1.bf16.msra.mxu0 %v5495_v6  ;;  %3479 = vmatpush1.bf16.msra.mxu1 %v5498_v7 }
 0x149   :  { %3254 = vmatprep.subr.bf16.mxu0 %v5503_v8  ;;  %3480 = vmatprep.subr.bf16.mxu1 %v5506_v9 }
 0x14c   :  { %3255 = vmatpush1.bf16.msra.mxu0 %v5501_v12  ;;  %3481 = vmatpush1.bf16.msra.mxu1 %v5504_v13 }
 0x14d   :  { %3256 = vmatprep.subr.bf16.mxu0 %v5509_v14  ;;  %3482 = vmatprep.subr.bf16.mxu1 %v5512_v15 }
 0x14e   :  { %4464 = vmatmul.mubr.msk.bf16.gmra.mrb[20].mxu0 %vm1421_vm0, %v208_v16  ;;  %4472 = vmatmul.mubr.msk.bf16.gmra.mrb[20].mxu1 %vm1421_vm0, %v208_v16 }
 0x14f   :  { %1877 = vmatprep.mubr.bf16.mxu0 %v5723_v22  ;;  %2329 = vmatprep.mubr.bf16.mxu1 %v5723_v22 }
 0x150   :  { %3257 = vmatpush1.bf16.msra.mxu0 %v5507_v17  ;;  %3483 = vmatpush1.bf16.msra.mxu1 %v5510_v18 }
 0x151   :  { %3258 = vmatprep.subr.bf16.mxu0 %v5515_v19  ;;  %3484 = vmatprep.subr.bf16.mxu1 %v5518_v20 }
 0x154   :  { %3259 = vmatpush1.bf16.msra.mxu0 %v5513_v24  ;;  %3485 = vmatpush1.bf16.msra.mxu1 %v5516_v25  ;;  %v5543_v25 = vld [vmem:[#allocation4 + $0x200] ss:$16 sps:$4 sm:$0xff]  }
 0x155   :  { %3260 = vmatprep.subr.bf16.mxu0 %v5521_v26  ;;  %3486 = vmatprep.subr.bf16.mxu1 %v5524_v27  ;;  %v5546_v26 = vld [vmem:[#allocation4 + $0x208] ss:$16 sps:$4 sm:$0xff]  }
 0x156   :  { %4465 = vmatmul.mubr.msk.bf16.gmra.mrb[24].mxu0 %vm1421_vm0, %v215_v28  ;;  %4473 = vmatmul.mubr.msk.bf16.gmra.mrb[24].mxu1 %vm1421_vm0, %v215_v28 }
 0x157   :  { %1887 = vmatprep.mubr.bf16.mxu0 %v5723_v22  ;;  %2339 = vmatprep.mubr.bf16.mxu1 %v5723_v22  ;;  %v5533_v22 = vld [vmem:[#allocation4 + $0x1c4] ss:$16 sps:$4 sm:$0xff]  }
 0x158   :  { %3261 = vmatpush1.bf16.msra.mxu0 %v5519_v29  ;;  %3487 = vmatpush1.bf16.msra.mxu1 %v5522_v30 }
 0x159   :  { %3262 = vmatprep.subr.bf16.mxu0 %v5527_v31  ;;  %3488 = vmatprep.subr.bf16.mxu1 %v5530_v32  ;;  %v5551_v31 = vld [vmem:[#allocation4 + $0x224] ss:$16 sps:$4 sm:$0xff]   ;;  %v5554_v32 = vld [vmem:[#allocation4 + $0x22c] ss:$16 sps:$4 sm:$0xff]  }
 0x15c   :  { %3263 = vmatpush1.bf16.msra.mxu0 %v5525_v35  ;;  %3489 = vmatpush1.bf16.msra.mxu1 %v5528_v36 }
 0x15d   :  { %3264 = vmatprep.subr.bf16.mxu0 %v5533_v22  ;;  %3490 = vmatprep.subr.bf16.mxu1 %v5536_v38 }
 0x15e   :  { %4466 = vmatmul.mubr.msk.bf16.gmra.mrb[28].mxu0 %vm1421_vm0, %v222_v37  ;;  %4474 = vmatmul.mubr.msk.bf16.gmra.mrb[28].mxu1 %vm1421_vm0, %v222_v37 }
 0x160   :  { %3265 = vmatpush1.bf16.msra.mxu0 %v5531_v39  ;;  %3491 = vmatpush1.bf16.msra.mxu1 %v5534_v40 }
 0x161   :  { %3266 = vmatprep.subr.bf16.mxu0 %v5539_v41  ;;  %3492 = vmatprep.subr.bf16.mxu1 %v5542_v42  ;;  %v5549_v42 = vld [vmem:[#allocation4 + $0x220] ss:$16 sps:$4 sm:$0xff]  }
 0x164   :  { %3267 = vmatpush1.bf16.msra.mxu0 %v5537_v43  ;;  %3493 = vmatpush1.bf16.msra.mxu1 %v5540_v44  ;;  %v5552_v43 = vld [vmem:[#allocation4 + $0x228] ss:$16 sps:$4 sm:$0xff]   ;;  %v5557_v44 = vld [vmem:[#allocation4 + $0x244] ss:$16 sps:$4 sm:$0xff]  }
 0x165   :  { %3349 = vmatprep.subr.bf16.mxu0 %v5545_v45  ;;  %3575 = vmatprep.subr.bf16.mxu1 %v5548_v46 }
 0x1f9   :  { %v1819_v58 = vpop.f32.mrb[0].mxu0  ;;  %v2271_v59 = vpop.f32.mrb[0].mxu1 }
 0x1fa   :  { %v4764_v60 = vadd.f32 %v1819_v58, %v6167_v54  ;;  %v4796_v61 = vadd.f32 %v2271_v59, %v6171_v55  ;;  %v1821_v62 = vpop.f32.mrb[1].mxu0  ;;  %v2273_v63 = vpop.f32.mrb[1].mxu1  ;;  %v5560_v58 = vld [vmem:[#allocation4 + $0x24c] ss:$16 sps:$4 sm:$0xff]  }
 0x1fb   :  { %v4765_v0 = vadd.f32 %v1821_v62, %v6175_v56  ;;  %v4797_v1 = vadd.f32 %v2273_v63, %v6179_v57  ;;  %v1823_v2 = vpop.f32.mrb[2].mxu0  ;;  %v2275_v3 = vpop.f32.mrb[2].mxu1 }
 0x1fc   :  { %v4766_v4 = vadd.f32 %v1823_v2, %v6167_v54  ;;  %v4798_v5 = vadd.f32 %v2275_v3, %v6171_v55  ;;  %v1825_v6 = vpop.f32.mrb[3].mxu0  ;;  %v2277_v7 = vpop.f32.mrb[3].mxu1  ;;  %v2350_v10 = vmax.f32 %v4764_v60, 0.0  ;;  %v2352_v11 = vmax.f32 %v4796_v61, 0.0 }
 0x1fd   :  { %v4767_v8 = vadd.f32 %v1825_v6, %v6175_v56  ;;  %v4799_v9 = vadd.f32 %v2277_v7, %v6179_v57  ;;  %v2351_v14 = vmax.f32 %v4765_v0, 0.0  ;;  %v2353_v15 = vmax.f32 %v4797_v1, 0.0  ;;  %v5558_v6 = vld [vmem:[#allocation4 + $0x248] ss:$16 sps:$4 sm:$0xff]  }
 0x1fe   :  { %v2354_v12 = vmax.f32 %v4766_v4, 0.0  ;;  %v2356_v13 = vmax.f32 %v4798_v5, 0.0  ;;  %v5555_v5 = vld [vmem:[#allocation4 + $0x240] ss:$16 sps:$4 sm:$0xff]  }
 0x1ff   :  { %v2355_v16 = vmax.f32 %v4767_v8, 0.0  ;;  %v2357_v17 = vmax.f32 %v4799_v9, 0.0 }
 0x200   :  { %v2414_v18 = vpack.c.bf16 %v2354_v12, %v2350_v10  ;;  %v6189_v19 = vpack.c.bf16 %v2356_v13, %v2352_v11  ;;  %v5563_v11 = vld [vmem:[#allocation4 + $0x264] ss:$16 sps:$4 sm:$0xff]   ;;  %v5566_v12 = vld [vmem:[#allocation4 + $0x26c] ss:$16 sps:$4 sm:$0xff]  }
 0x201   :  { %v2415_v20 = vpack.c.bf16 %v2355_v16, %v2351_v14  ;;  %v6191_v21 = vpack.c.bf16 %v2357_v17, %v2353_v15  ;;  %v1829_v23 = vpop.f32.mrb[4].mxu0  ;;  %v2281_v24 = vpop.f32.mrb[4].mxu1 }
 0x202   :  { %v4768_v27 = vadd.f32 %v1829_v23, %v6167_v54  ;;  %v4800_v28 = vadd.f32 %v2281_v24, %v6171_v55  ;;  %v1831_v29 = vpop.f32.mrb[5].mxu0  ;;  %v2283_v30 = vpop.f32.mrb[5].mxu1 }
 0x203   :  { %v4769_v33 = vadd.f32 %v1831_v29, %v6175_v56  ;;  %v4801_v34 = vadd.f32 %v2283_v30, %v6179_v57  ;;  %v1833_v35 = vpop.f32.mrb[6].mxu0  ;;  %v2285_v36 = vpop.f32.mrb[6].mxu1  ;;  %3268 = vmatprep.mubr.bf16.mxu0 %v2415_v20  ;;  %3494 = vmatprep.mubr.bf16.mxu1 %v2415_v20 }
 0x204   :  { %v4770_v37 = vadd.f32 %v1833_v35, %v6167_v54  ;;  %v4802_v22 = vadd.f32 %v2285_v36, %v6171_v55  ;;  %v1835_v38 = vpop.f32.mrb[7].mxu0  ;;  %v2287_v39 = vpop.f32.mrb[7].mxu1  ;;  %3269 = vmatmul.mubr.bf16.vlgmr.msra.gmra.mrb[32].mxu0 %v2414_v18  ;;  %3495 = vmatmul.mubr.bf16.vlgmr.msra.gmra.mrb[32].mxu1 %v2414_v18  ;;  %v2358_v45 = vmax.f32 %v4768_v27, 0.0  ;;  %v2360_v46 = vmax.f32 %v4800_v28, 0.0  ;;  %v5564_v27 = vld [vmem:[#allocation4 + $0x268] ss:$16 sps:$4 sm:$0xff]  }
 0x205   :  { %v4771_v40 = vadd.f32 %v1835_v38, %v6175_v56  ;;  %v4803_v41 = vadd.f32 %v2287_v39, %v6179_v57  ;;  %3350 = vmatpush1.bf16.msra.mxu0 %v5543_v25  ;;  %3576 = vmatpush1.bf16.msra.mxu1 %v5546_v26  ;;  %v2359_v59 = vmax.f32 %v4769_v33, 0.0  ;;  %v2361_v60 = vmax.f32 %v4801_v34, 0.0  ;;  %v5561_v26 = vld [vmem:[#allocation4 + $0x260] ss:$16 sps:$4 sm:$0xff]   ;;  %v5569_v28 = vld [vmem:[#allocation4 + $0x284] ss:$16 sps:$4 sm:$0xff]  }
 0x206   :  { %v2362_v47 = vmax.f32 %v4770_v37, 0.0  ;;  %v2364_v51 = vmax.f32 %v4802_v22, 0.0  ;;  %3351 = vmatprep.subr.bf16.mxu0 %v5551_v31  ;;  %3577 = vmatprep.subr.bf16.mxu1 %v5554_v32  ;;  %v5572_v33 = vld [vmem:[#allocation4 + $0x28c] ss:$16 sps:$4 sm:$0xff]  }
 0x207   :  { %v2363_v61 = vmax.f32 %v4771_v40, 0.0  ;;  %v2365_v62 = vmax.f32 %v4803_v41, 0.0 }
 0x208   :  { %v2418_v63 = vpack.c.bf16 %v2362_v47, %v2358_v45  ;;  %v6201_v0 = vpack.c.bf16 %v2364_v51, %v2360_v46 }
 0x209   :  { %v2419_v1 = vpack.c.bf16 %v2363_v61, %v2359_v59  ;;  %v6203_v2 = vpack.c.bf16 %v2365_v62, %v2361_v60  ;;  %v1839_v3 = vpop.f32.mrb[8].mxu0  ;;  %v2291_v4 = vpop.f32.mrb[8].mxu1  ;;  %3352 = vmatpush1.bf16.msra.mxu0 %v5549_v42  ;;  %3578 = vmatpush1.bf16.msra.mxu1 %v5552_v43  ;;  %v5567_v43 = vld [vmem:[#allocation4 + $0x280] ss:$16 sps:$4 sm:$0xff]   ;;  %v5578_v59 = vld [vmem:[#allocation4 + $0x2ac] ss:$16 sps:$4 sm:$0xff]  }
 0x20a   :  { %v4772_v7 = vadd.f32 %v1839_v3, %v6167_v54  ;;  %v4804_v8 = vadd.f32 %v2291_v4, %v6171_v55  ;;  %v1841_v9 = vpop.f32.mrb[9].mxu0  ;;  %v2293_v10 = vpop.f32.mrb[9].mxu1  ;;  %3353 = vmatprep.subr.bf16.mxu0 %v5557_v44  ;;  %3579 = vmatprep.subr.bf16.mxu1 %v5560_v58  ;;  %v5570_v44 = vld [vmem:[#allocation4 + $0x288] ss:$16 sps:$4 sm:$0xff]   ;;  %v5575_v58 = vld [vmem:[#allocation4 + $0x2a4] ss:$16 sps:$4 sm:$0xff]  }
 0x20b   :  { %v4773_v13 = vadd.f32 %v1841_v9, %v6175_v56  ;;  %v4805_v14 = vadd.f32 %v2293_v10, %v6179_v57  ;;  %v1843_v15 = vpop.f32.mrb[10].mxu0  ;;  %v2295_v16 = vpop.f32.mrb[10].mxu1  ;;  %3278 = vmatprep.mubr.bf16.mxu0 %v2419_v1  ;;  %3504 = vmatprep.mubr.bf16.mxu1 %v2419_v1  ;;  %v5576_v9 = vld [vmem:[#allocation4 + $0x2a8] ss:$16 sps:$4 sm:$0xff]   ;;  %v5581_v10 = vld [vmem:[#allocation4 + $0x2c4] ss:$16 sps:$4 sm:$0xff]  }
 0x20c   :  { %v4774_v17 = vadd.f32 %v1843_v15, %v6167_v54  ;;  %v4806_v18 = vadd.f32 %v2295_v16, %v6171_v55  ;;  %v1845_v20 = vpop.f32.mrb[11].mxu0  ;;  %v2297_v23 = vpop.f32.mrb[11].mxu1  ;;  %3279 = vmatmul.mubr.bf16.gmra.mrb[36].mxu0 %v2418_v63  ;;  %3505 = vmatmul.mubr.bf16.gmra.mrb[36].mxu1 %v2418_v63  ;;  %v2366_v29 = vmax.f32 %v4772_v7, 0.0  ;;  %v2368_v30 = vmax.f32 %v4804_v8, 0.0  ;;  %v5573_v8 = vld [vmem:[#allocation4 + $0x2a0] ss:$16 sps:$4 sm:$0xff]  }
 0x20d   :  { %v4775_v24 = vadd.f32 %v1845_v20, %v6175_v56  ;;  %v4807_v25 = vadd.f32 %v2297_v23, %v6179_v57  ;;  %3354 = vmatpush1.bf16.msra.mxu0 %v5555_v5  ;;  %3580 = vmatpush1.bf16.msra.mxu1 %v5558_v6  ;;  %v2367_v34 = vmax.f32 %v4773_v13, 0.0  ;;  %v2369_v35 = vmax.f32 %v4805_v14, 0.0  ;;  %v5584_v15 = vld [vmem:[#allocation4 + $0x2cc] ss:$16 sps:$4 sm:$0xff]  }
 0x20e   :  { %v2370_v31 = vmax.f32 %v4774_v17, 0.0  ;;  %v2372_v32 = vmax.f32 %v4806_v18, 0.0  ;;  %3355 = vmatprep.subr.bf16.mxu0 %v5563_v11  ;;  %3581 = vmatprep.subr.bf16.mxu1 %v5566_v12 }
 0x20f   :  { %v2371_v36 = vmax.f32 %v4775_v24, 0.0  ;;  %v2373_v37 = vmax.f32 %v4807_v25, 0.0 }
 0x210   :  { %v2422_v22 = vpack.c.bf16 %v2370_v31, %v2366_v29  ;;  %v6213_v38 = vpack.c.bf16 %v2372_v32, %v2368_v30  ;;  %v5579_v29 = vld [vmem:[#allocation4 + $0x2c0] ss:$16 sps:$4 sm:$0xff]   ;;  %v5582_v30 = vld [vmem:[#allocation4 + $0x2c8] ss:$16 sps:$4 sm:$0xff]  }
 0x211   :  { %v2423_v39 = vpack.c.bf16 %v2371_v36, %v2367_v34  ;;  %v6215_v40 = vpack.c.bf16 %v2373_v37, %v2369_v35  ;;  %v1849_v41 = vpop.f32.mrb[12].mxu0  ;;  %v2301_v42 = vpop.f32.mrb[12].mxu1  ;;  %3356 = vmatpush1.bf16.msra.mxu0 %v5561_v26  ;;  %3582 = vmatpush1.bf16.msra.mxu1 %v5564_v27  ;;  %v5587_v35 = vld [vmem:[#allocation4 + $0x2e4] ss:$16 sps:$4 sm:$0xff]   ;;  %v5590_v36 = vld [vmem:[#allocation4 + $0x2ec] ss:$16 sps:$4 sm:$0xff]  }
 0x212   :  { %v4776_v45 = vadd.f32 %v1849_v41, %v6167_v54  ;;  %v4808_v46 = vadd.f32 %v2301_v42, %v6171_v55  ;;  %v1851_v47 = vpop.f32.mrb[13].mxu0  ;;  %v2303_v51 = vpop.f32.mrb[13].mxu1  ;;  %3357 = vmatprep.subr.bf16.mxu0 %v5569_v28  ;;  %3583 = vmatprep.subr.bf16.mxu1 %v5572_v33 }
 0x213   :  { %v4777_v60 = vadd.f32 %v1851_v47, %v6175_v56  ;;  %v4809_v61 = vadd.f32 %v2303_v51, %v6179_v57  ;;  %v1853_v62 = vpop.f32.mrb[14].mxu0  ;;  %v2305_v63 = vpop.f32.mrb[14].mxu1  ;;  %3288 = vmatprep.mubr.bf16.mxu0 %v2423_v39  ;;  %3514 = vmatprep.mubr.bf16.mxu1 %v2423_v39  ;;  %v5585_v51 = vld [vmem:[#allocation4 + $0x2e0] ss:$16 sps:$4 sm:$0xff]  }
 0x214   :  { %v4778_v1 = vadd.f32 %v1853_v62, %v6167_v54  ;;  %v4810_v3 = vadd.f32 %v2305_v63, %v6171_v55  ;;  %v1855_v4 = vpop.f32.mrb[15].mxu0  ;;  %v2307_v5 = vpop.f32.mrb[15].mxu1  ;;  %3289 = vmatmul.mubr.bf16.gmra.mrb[40].mxu0 %v2422_v22  ;;  %3515 = vmatmul.mubr.bf16.gmra.mrb[40].mxu1 %v2422_v22  ;;  %v2374_v11 = vmax.f32 %v4776_v45, 0.0  ;;  %v2376_v12 = vmax.f32 %v4808_v46, 0.0 }
 0x215   :  { %v4779_v6 = vadd.f32 %v1855_v4, %v6175_v56  ;;  %v4811_v7 = vadd.f32 %v2307_v5, %v6179_v57  ;;  %3358 = vmatpush1.bf16.msra.mxu0 %v5567_v43  ;;  %3584 = vmatpush1.bf16.msra.mxu1 %v5570_v44  ;;  %v2375_v16 = vmax.f32 %v4777_v60, 0.0  ;;  %v2377_v17 = vmax.f32 %v4809_v61, 0.0 }
 0x216   :  { %v2378_v13 = vmax.f32 %v4778_v1, 0.0  ;;  %v2380_v14 = vmax.f32 %v4810_v3, 0.0  ;;  %3359 = vmatprep.subr.bf16.mxu0 %v5575_v58  ;;  %3585 = vmatprep.subr.bf16.mxu1 %v5578_v59  ;;  %v5588_v58 = vld [vmem:[#allocation4 + $0x2e8] ss:$16 sps:$4 sm:$0xff]   ;;  %v5593_v59 = vld [vmem:[#allocation4 + $0x304] ss:$16 sps:$4 sm:$0xff]  }
 0x217   :  { %v2379_v18 = vmax.f32 %v4779_v6, 0.0  ;;  %v2381_v20 = vmax.f32 %v4811_v7, 0.0  ;;  %v5596_v1 = vld [vmem:[#allocation4 + $0x30c] ss:$16 sps:$4 sm:$0xff]  }
 0x218   :  { %v2426_v23 = vpack.c.bf16 %v2378_v13, %v2374_v11  ;;  %v6225_v24 = vpack.c.bf16 %v2380_v14, %v2376_v12  ;;  %v5591_v13 = vld [vmem:[#allocation4 + $0x300] ss:$16 sps:$4 sm:$0xff]   ;;  %v5594_v14 = vld [vmem:[#allocation4 + $0x308] ss:$16 sps:$4 sm:$0xff]  }
 0x219   :  { %v2427_v25 = vpack.c.bf16 %v2379_v18, %v2375_v16  ;;  %v6227_v26 = vpack.c.bf16 %v2381_v20, %v2377_v17  ;;  %v1859_v27 = vpop.f32.mrb[16].mxu0  ;;  %v2311_v28 = vpop.f32.mrb[16].mxu1  ;;  %3360 = vmatpush1.bf16.msra.mxu0 %v5573_v8  ;;  %3586 = vmatpush1.bf16.msra.mxu1 %v5576_v9  ;;  %v5599_v20 = vld [vmem:[#allocation4 + $0x324] ss:$16 sps:$4 sm:$0xff]  }
 0x21a   :  { %v4780_v31 = vadd.f32 %v1859_v27, %v6167_v54  ;;  %v4812_v32 = vadd.f32 %v2311_v28, %v6171_v55  ;;  %v1861_v33 = vpop.f32.mrb[17].mxu0  ;;  %v2313_v34 = vpop.f32.mrb[17].mxu1  ;;  %3361 = vmatprep.subr.bf16.mxu0 %v5581_v10  ;;  %3587 = vmatprep.subr.bf16.mxu1 %v5584_v15 }
 0x21b   :  { %v4781_v37 = vadd.f32 %v1861_v33, %v6175_v56  ;;  %v4813_v22 = vadd.f32 %v2313_v34, %v6179_v57  ;;  %v1863_v39 = vpop.f32.mrb[18].mxu0  ;;  %v2315_v41 = vpop.f32.mrb[18].mxu1  ;;  %3298 = vmatprep.mubr.bf16.mxu0 %v2427_v25  ;;  %3524 = vmatprep.mubr.bf16.mxu1 %v2427_v25 }
 0x21c   :  { %v4782_v42 = vadd.f32 %v1863_v39, %v6167_v54  ;;  %v4814_v43 = vadd.f32 %v2315_v41, %v6171_v55  ;;  %v1865_v44 = vpop.f32.mrb[19].mxu0  ;;  %v2317_v45 = vpop.f32.mrb[19].mxu1  ;;  %3299 = vmatmul.mubr.bf16.gmra.mrb[44].mxu0 %v2426_v23  ;;  %3525 = vmatmul.mubr.bf16.gmra.mrb[44].mxu1 %v2426_v23  ;;  %v2382_v60 = vmax.f32 %v4780_v31, 0.0  ;;  %v2384_v61 = vmax.f32 %v4812_v32, 0.0  ;;  %v5602_v23 = vld [vmem:[#allocation4 + $0x32c] ss:$16 sps:$4 sm:$0xff]  }
 0x21d   :  { %v4783_v46 = vadd.f32 %v1865_v44, %v6175_v56  ;;  %v4815_v47 = vadd.f32 %v2317_v45, %v6179_v57  ;;  %3362 = vmatpush1.bf16.msra.mxu0 %v5579_v29  ;;  %3588 = vmatpush1.bf16.msra.mxu1 %v5582_v30  ;;  %v2383_v3 = vmax.f32 %v4781_v37, 0.0  ;;  %v2385_v4 = vmax.f32 %v4813_v22, 0.0  ;;  %v5600_v37 = vld [vmem:[#allocation4 + $0x328] ss:$16 sps:$4 sm:$0xff]   ;;  %v5605_v22 = vld [vmem:[#allocation4 + $0x344] ss:$16 sps:$4 sm:$0xff]  }
 0x21e   :  { %v2386_v62 = vmax.f32 %v4782_v42, 0.0  ;;  %v2388_v63 = vmax.f32 %v4814_v43, 0.0  ;;  %3363 = vmatprep.subr.bf16.mxu0 %v5587_v35  ;;  %3589 = vmatprep.subr.bf16.mxu1 %v5590_v36  ;;  %v5597_v36 = vld [vmem:[#allocation4 + $0x320] ss:$16 sps:$4 sm:$0xff]   ;;  %v5608_v44 = vld [vmem:[#allocation4 + $0x34c] ss:$16 sps:$4 sm:$0xff]  }
 0x21f   :  { %v2387_v5 = vmax.f32 %v4783_v46, 0.0  ;;  %v2389_v6 = vmax.f32 %v4815_v47, 0.0 }
 0x220   :  { %v2430_v7 = vpack.c.bf16 %v2386_v62, %v2382_v60  ;;  %v6237_v8 = vpack.c.bf16 %v2388_v63, %v2384_v61 }
 0x221   :  { %v2431_v9 = vpack.c.bf16 %v2387_v5, %v2383_v3  ;;  %v6239_v10 = vpack.c.bf16 %v2389_v6, %v2385_v4  ;;  %v1869_v11 = vpop.f32.mrb[20].mxu0  ;;  %v2321_v12 = vpop.f32.mrb[20].mxu1  ;;  %3364 = vmatpush1.bf16.msra.mxu0 %v5585_v51  ;;  %3590 = vmatpush1.bf16.msra.mxu1 %v5588_v58  ;;  %v5606_v3 = vld [vmem:[#allocation4 + $0x348] ss:$16 sps:$4 sm:$0xff]  }
 0x222   :  { %v4784_v15 = vadd.f32 %v1869_v11, %v6167_v54  ;;  %v4816_v16 = vadd.f32 %v2321_v12, %v6171_v55  ;;  %v1871_v17 = vpop.f32.mrb[21].mxu0  ;;  %v2323_v18 = vpop.f32.mrb[21].mxu1  ;;  %3365 = vmatprep.subr.bf16.mxu0 %v5593_v59  ;;  %3591 = vmatprep.subr.bf16.mxu1 %v5596_v1  ;;  %v5603_v1 = vld [vmem:[#allocation4 + $0x340] ss:$16 sps:$4 sm:$0xff]   ;;  %v5614_v11 = vld [vmem:[#allocation4 + $0x36c] ss:$16 sps:$4 sm:$0xff]  }
 0x223   :  { %v4785_v25 = vadd.f32 %v1871_v17, %v6175_v56  ;;  %v4817_v27 = vadd.f32 %v2323_v18, %v6179_v57  ;;  %v1873_v28 = vpop.f32.mrb[22].mxu0  ;;  %v2325_v29 = vpop.f32.mrb[22].mxu1  ;;  %3308 = vmatprep.mubr.bf16.mxu0 %v2431_v9  ;;  %3534 = vmatprep.mubr.bf16.mxu1 %v2431_v9  ;;  %v5611_v9 = vld [vmem:[#allocation4 + $0x364] ss:$16 sps:$4 sm:$0xff]  }
 0x224   :  { %v4786_v30 = vadd.f32 %v1873_v28, %v6167_v54  ;;  %v4818_v31 = vadd.f32 %v2325_v29, %v6171_v55  ;;  %v1875_v32 = vpop.f32.mrb[23].mxu0  ;;  %v2327_v33 = vpop.f32.mrb[23].mxu1  ;;  %3309 = vmatmul.mubr.bf16.gmra.mrb[48].mxu0 %v2430_v7  ;;  %3535 = vmatmul.mubr.bf16.gmra.mrb[48].mxu1 %v2430_v7  ;;  %v2390_v39 = vmax.f32 %v4784_v15, 0.0  ;;  %v2392_v41 = vmax.f32 %v4816_v16, 0.0  ;;  %v5612_v28 = vld [vmem:[#allocation4 + $0x368] ss:$16 sps:$4 sm:$0xff]  }
 0x225   :  { %v4787_v34 = vadd.f32 %v1875_v32, %v6175_v56  ;;  %v4819_v35 = vadd.f32 %v2327_v33, %v6179_v57  ;;  %3366 = vmatpush1.bf16.msra.mxu0 %v5591_v13  ;;  %3592 = vmatpush1.bf16.msra.mxu1 %v5594_v14  ;;  %v2391_v45 = vmax.f32 %v4785_v25, 0.0  ;;  %v2393_v46 = vmax.f32 %v4817_v27, 0.0  ;;  %v5609_v27 = vld [vmem:[#allocation4 + $0x360] ss:$16 sps:$4 sm:$0xff]   ;;  %v5617_v29 = vld [vmem:[#allocation4 + $0x384] ss:$16 sps:$4 sm:$0xff]  }
 0x226   :  { %v2394_v42 = vmax.f32 %v4786_v30, 0.0  ;;  %v2396_v43 = vmax.f32 %v4818_v31, 0.0  ;;  %3367 = vmatprep.subr.bf16.mxu0 %v5599_v20  ;;  %3593 = vmatprep.subr.bf16.mxu1 %v5602_v23 }
 0x227   :  { %v2395_v47 = vmax.f32 %v4787_v34, 0.0  ;;  %v2397_v51 = vmax.f32 %v4819_v35, 0.0  ;;  %v5620_v34 = vld [vmem:[#allocation4 + $0x38c] ss:$16 sps:$4 sm:$0xff]  }
 0x228   :  { %v2434_v58 = vpack.c.bf16 %v2394_v42, %v2390_v39  ;;  %v6249_v59 = vpack.c.bf16 %v2396_v43, %v2392_v41 }
 0x229   :  { %v2435_v60 = vpack.c.bf16 %v2395_v47, %v2391_v45  ;;  %v6251_v61 = vpack.c.bf16 %v2397_v51, %v2393_v46  ;;  %v1879_v62 = vpop.f32.mrb[24].mxu0  ;;  %v2331_v63 = vpop.f32.mrb[24].mxu1  ;;  %3368 = vmatpush1.bf16.msra.mxu0 %v5597_v36  ;;  %3594 = vmatpush1.bf16.msra.mxu1 %v5600_v37  ;;  %v5615_v46 = vld [vmem:[#allocation4 + $0x380] ss:$16 sps:$4 sm:$0xff]   ;;  %v5618_v47 = vld [vmem:[#allocation4 + $0x388] ss:$16 sps:$4 sm:$0xff]  }
 0x22a   :  { %v4788_v4 = vadd.f32 %v1879_v62, %v6167_v54  ;;  %v4820_v5 = vadd.f32 %v2331_v63, %v6171_v55  ;;  %v1881_v6 = vpop.f32.mrb[25].mxu0  ;;  %v2333_v7 = vpop.f32.mrb[25].mxu1  ;;  %3369 = vmatprep.subr.bf16.mxu0 %v5605_v22  ;;  %3595 = vmatprep.subr.bf16.mxu1 %v5608_v44  ;;  %v5623_v63 = vld [vmem:[#allocation4 + $0x3a4] ss:$16 sps:$4 sm:$0xff]  }
 0x22b   :  { %v4789_v12 = vadd.f32 %v1881_v6, %v6175_v56  ;;  %v4821_v13 = vadd.f32 %v2333_v7, %v6179_v57  ;;  %v1883_v14 = vpop.f32.mrb[26].mxu0  ;;  %v2335_v15 = vpop.f32.mrb[26].mxu1  ;;  %3318 = vmatprep.mubr.bf16.mxu0 %v2435_v60  ;;  %3544 = vmatprep.mubr.bf16.mxu1 %v2435_v60 }
 0x22c   :  { %v4790_v16 = vadd.f32 %v1883_v14, %v6167_v54  ;;  %v4822_v17 = vadd.f32 %v2335_v15, %v6171_v55  ;;  %v1885_v18 = vpop.f32.mrb[27].mxu0  ;;  %v2337_v20 = vpop.f32.mrb[27].mxu1  ;;  %3319 = vmatmul.mubr.bf16.gmra.mrb[52].mxu0 %v2434_v58  ;;  %3545 = vmatmul.mubr.bf16.gmra.mrb[52].mxu1 %v2434_v58  ;;  %v2398_v30 = vmax.f32 %v4788_v4, 0.0  ;;  %v2400_v31 = vmax.f32 %v4820_v5, 0.0  ;;  %v5621_v15 = vld [vmem:[#allocation4 + $0x3a0] ss:$16 sps:$4 sm:$0xff]  }
 0x22d   :  { %v4791_v23 = vadd.f32 %v1885_v18, %v6175_v56  ;;  %v4823_v25 = vadd.f32 %v2337_v20, %v6179_v57  ;;  %3370 = vmatpush1.bf16.msra.mxu0 %v5603_v1  ;;  %3596 = vmatpush1.bf16.msra.mxu1 %v5606_v3  ;;  %v2399_v35 = vmax.f32 %v4789_v12, 0.0  ;;  %v2401_v36 = vmax.f32 %v4821_v13, 0.0  ;;  %v5626_v1 = vld [vmem:[#allocation4 + $0x3ac] ss:$16 sps:$4 sm:$0xff]  }
 0x22e   :  { %v2402_v32 = vmax.f32 %v4790_v16, 0.0  ;;  %v2404_v33 = vmax.f32 %v4822_v17, 0.0  ;;  %3371 = vmatprep.subr.bf16.mxu0 %v5611_v9  ;;  %3597 = vmatprep.subr.bf16.mxu1 %v5614_v11  ;;  %v5624_v16 = vld [vmem:[#allocation4 + $0x3a8] ss:$16 sps:$4 sm:$0xff]   ;;  %v5629_v17 = vld [vmem:[#allocation4 + $0x3c4] ss:$16 sps:$4 sm:$0xff]  }
 0x22f   :  { %v2403_v37 = vmax.f32 %v4791_v23, 0.0  ;;  %v2405_v22 = vmax.f32 %v4823_v25, 0.0 }
 0x230   :  { %v2438_v39 = vpack.c.bf16 %v2402_v32, %v2398_v30  ;;  %v6261_v41 = vpack.c.bf16 %v2404_v33, %v2400_v31  ;;  %v5627_v32 = vld [vmem:[#allocation4 + $0x3c0] ss:$16 sps:$4 sm:$0xff]   ;;  %v5630_v33 = vld [vmem:[#allocation4 + $0x3c8] ss:$16 sps:$4 sm:$0xff]  }
 0x231   :  { %v2439_v42 = vpack.c.bf16 %v2403_v37, %v2399_v35  ;;  %v6263_v43 = vpack.c.bf16 %v2405_v22, %v2401_v36  ;;  %v1889_v44 = vpop.f32.mrb[28].mxu0  ;;  %v2341_v45 = vpop.f32.mrb[28].mxu1  ;;  %3372 = vmatpush1.bf16.msra.mxu0 %v5609_v27  ;;  %3598 = vmatpush1.bf16.msra.mxu1 %v5612_v28  ;;  %v5638_v35 = vld [vmem:[#allocation4 + $0x3ec] ss:$16 sps:$4 sm:$0xff]   ;;  %v5633_v36 = vld [vmem:[#allocation4 + $0x3e0] ss:$16 sps:$4 sm:$0xff]  }
 0x232   :  { %v4792_v51 = vadd.f32 %v1889_v44, %v6167_v54  ;;  %v4824_v58 = vadd.f32 %v2341_v45, %v6171_v55  ;;  %v1891_v60 = vpop.f32.mrb[29].mxu0  ;;  %v2343_v62 = vpop.f32.mrb[29].mxu1  ;;  %3373 = vmatprep.subr.bf16.mxu0 %v5617_v29  ;;  %3599 = vmatprep.subr.bf16.mxu1 %v5620_v34  ;;  %v5635_v34 = vld [vmem:[#allocation4 + $0x3e4] ss:$16 sps:$4 sm:$0xff]   ;;  %v5636_v37 = vld [vmem:[#allocation4 + $0x3e8] ss:$16 sps:$4 sm:$0xff]  }
 0x233   :  { %v4793_v3 = vadd.f32 %v1891_v60, %v6175_v56  ;;  %v4825_v4 = vadd.f32 %v2343_v62, %v6179_v57  ;;  %v1893_v5 = vpop.f32.mrb[30].mxu0  ;;  %v2345_v6 = vpop.f32.mrb[30].mxu1  ;;  %3328 = vmatprep.mubr.bf16.mxu0 %v2439_v42  ;;  %3554 = vmatprep.mubr.bf16.mxu1 %v2439_v42  ;;  %v5639_v22 = vld [vmem:[%s6562_s5 + $0x40] sm:$0xff]   ;;  %v5643_v44 = vld [vmem:[%s6562_s5 + $0x48] sm:$0xff]   ;;  %v5651_v60 = vld [vmem:[%s6562_s5 + $0x58] sm:$0xff]  }
 0x234   :  { %v4794_v7 = vadd.f32 %v1893_v5, %v6167_v54  ;;  %v4826_v9 = vadd.f32 %v2345_v6, %v6171_v55  ;;  %v1895_v11 = vpop.f32.mrb[31].mxu0  ;;  %v2347_v12 = vpop.f32.mrb[31].mxu1  ;;  %3329 = vmatmul.mubr.bf16.gmra.mrb[56].mxu0 %v2438_v39  ;;  %3555 = vmatmul.mubr.bf16.gmra.mrb[56].mxu1 %v2438_v39  ;;  %v2406_v18 = vmax.f32 %v4792_v51, 0.0  ;;  %v2408_v20 = vmax.f32 %v4824_v58, 0.0  ;;  %v5632_v54 = vld [vmem:[#allocation4 + $0x3cc] ss:$16 sps:$4 sm:$0xff]  }
 0x235   :  { %v4795_v13 = vadd.f32 %v1895_v11, %v6175_v56  ;;  %v4827_v14 = vadd.f32 %v2347_v12, %v6179_v57  ;;  %3374 = vmatpush1.bf16.msra.mxu0 %v5615_v46  ;;  %3600 = vmatpush1.bf16.msra.mxu1 %v5618_v47  ;;  %v2407_v55 = vmax.f32 %v4793_v3, 0.0  ;;  %v2409_v27 = vmax.f32 %v4825_v4, 0.0  ;;  %v5641_v39 = vld [vmem:[%s6562_s5 + $0xc0] sm:$0xff]   ;;  %v5645_v45 = vld [vmem:[%s6562_s5 + $0xc8] sm:$0xff]   ;;  %v5647_v51 = vld [vmem:[%s6562_s5 + $0x50] sm:$0xff]  }
 0x236   :  { %v2410_v23 = vmax.f32 %v4794_v7, 0.0  ;;  %v2412_v25 = vmax.f32 %v4826_v9, 0.0  ;;  %3375 = vmatprep.subr.bf16.mxu0 %v5623_v63  ;;  %3601 = vmatprep.subr.bf16.mxu1 %v5626_v1  ;;  %v5640_v42 = vld [vmem:[%s6562_s5] sm:$0xff]   ;;  %v5644_v46 = vld [vmem:[%s6562_s5 + $0x8] sm:$0xff]   ;;  %v5650_v58 = vld [vmem:[%s6562_s5 + $0x90] sm:$0xff]  }
 0x237   :  { %v2411_v28 = vmax.f32 %v4795_v13, 0.0  ;;  %v2413_v29 = vmax.f32 %v4827_v14, 0.0  ;;  %v5646_v47 = vld [vmem:[%s6562_s5 + $0x88] sm:$0xff]   ;;  %v5653_v62 = vld [vmem:[%s6562_s5 + $0xd8] sm:$0xff]   ;;  %v5655_v3 = vld [vmem:[%s6562_s5 + $0x60] sm:$0xff]  }
 0x238   :  { %v2442_v30 = vpack.c.bf16 %v2410_v23, %v2406_v18  ;;  %v6273_v56 = vpack.c.bf16 %v2412_v25, %v2408_v20  ;;  %v5652_v63 = vld [vmem:[%s6562_s5 + $0x18] sm:$0xff]   ;;  %v5658_v4 = vld [vmem:[%s6562_s5 + $0xa0] sm:$0xff]   ;;  %v5659_v5 = vld [vmem:[%s6562_s5 + $0x68] sm:$0xff]  }
 0x239   :  { %v2443_v57 = vpack.c.bf16 %v2411_v28, %v2407_v55  ;;  %v6275_v31 = vpack.c.bf16 %v2413_v29, %v2409_v27  ;;  %3376 = vmatpush1.bf16.msra.mxu0 %v5621_v15  ;;  %3602 = vmatpush1.bf16.msra.mxu1 %v5624_v16  ;;  %v5654_v1 = vld [vmem:[%s6562_s5 + $0x98] sm:$0xff]   ;;  %v5661_v6 = vld [vmem:[%s6562_s5 + $0xe8] sm:$0xff]   ;;  %v5663_v11 = vld [vmem:[%s6562_s5 + $0x70] sm:$0xff]  }
 0x23a   :  { %3377 = vmatprep.subr.bf16.mxu0 %v5629_v17  ;;  %3603 = vmatprep.subr.bf16.mxu1 %v5632_v54  ;;  %v5660_v7 = vld [vmem:[%s6562_s5 + $0x28] sm:$0xff]   ;;  %v5666_v12 = vld [vmem:[%s6562_s5 + $0xb0] sm:$0xff]  }
 0x23b   :  { %3338 = vmatprep.mubr.bf16.mxu0 %v2443_v57  ;;  %3564 = vmatprep.mubr.bf16.mxu1 %v2443_v57  ;;  %v5662_v9 = vld [vmem:[%s6562_s5 + $0xa8] sm:$0xff]  }
 0x23c   :  { %3339 = vmatmul.mubr.bf16.gmra.mrb[60].mxu0 %v2442_v30  ;;  %3565 = vmatmul.mubr.bf16.gmra.mrb[60].mxu1 %v2442_v30 }
 0x23d   :  { %3378 = vmatpush1.bf16.msra.mxu0 %v5627_v32  ;;  %3381 = vmatprep.mubr.bf16.mxu0 %v6191_v21 }
 0x23e   :  { %3604 = vmatpush1.bf16.msra.mxu1 %v5630_v33  ;;  %3607 = vmatprep.mubr.bf16.mxu1 %v6191_v21  ;;  %v5642_v21 = vld [vmem:[%s6562_s5 + $0x80] sm:$0xff]  }
 0x23f   :  { %3379 = vmatprep.subr.bf16.mxu0 %v5635_v34  ;;  %3605 = vmatprep.subr.bf16.mxu1 %v5638_v35 }
 0x241   :  { %3380 = vmatpush1.bf16.msra.mxu0 %v5633_v36 }
 0x242   :  { %3606 = vmatpush1.bf16.msra.mxu1 %v5636_v37  ;;  %4636 = vmatprep.subr.bf16.mxu0 %v5639_v22 }
 0x243   :  { %4700 = vmatprep.subr.bf16.mxu1 %v5641_v39 }
 0x244   :  { %3382 = vmatmul.mubr.bf16.vlgmr.msra.gmra.mrb[32].mxu0 %v6189_v19 }
 0x245   :  { %3608 = vmatmul.mubr.bf16.vlgmr.msra.gmra.mrb[32].mxu1 %v6189_v19  ;;  %3391 = vmatprep.mubr.bf16.mxu0 %v6203_v2  ;;  %v5649_v19 = vld [vmem:[%s6562_s5 + $0xd0] sm:$0xff]  }
 0x246   :  { %3617 = vmatprep.mubr.bf16.mxu1 %v6203_v2  ;;  %4637 = vmatpush3.bf16.msra.mxu0 %v5640_v42  ;;  %v5648_v2 = vld [vmem:[%s6562_s5 + $0x10] sm:$0xff]  }
 0x247   :  { %4701 = vmatpush3.bf16.msra.mxu1 %v5642_v21  ;;  %4638 = vmatprep.subr.bf16.mxu0 %v5643_v44 }
 0x248   :  { %4702 = vmatprep.subr.bf16.mxu1 %v5645_v45 }
 0x24a   :  { %4639 = vmatpush3.bf16.msra.mxu0 %v5644_v46 }
 0x24b   :  { %4703 = vmatpush3.bf16.msra.mxu1 %v5646_v47  ;;  %4640 = vmatprep.subr.bf16.mxu0 %v5647_v51 }
 0x24c   :  { %3392 = vmatmul.mubr.bf16.gmra.mrb[36].mxu0 %v6201_v0  ;;  %4704 = vmatprep.subr.bf16.mxu1 %v5649_v19 }
 0x24d   :  { %3618 = vmatmul.mubr.bf16.gmra.mrb[36].mxu1 %v6201_v0  ;;  %3401 = vmatprep.mubr.bf16.mxu0 %v6215_v40  ;;  %v5657_v0 = vld [vmem:[%s6562_s5 + $0xe0] sm:$0xff]  }
 0x24e   :  { %3627 = vmatprep.mubr.bf16.mxu1 %v6215_v40  ;;  %4641 = vmatpush3.bf16.msra.mxu0 %v5648_v2  ;;  %v5656_v40 = vld [vmem:[%s6562_s5 + $0x20] sm:$0xff]  }
 0x24f   :  { %4705 = vmatpush3.bf16.msra.mxu1 %v5650_v58  ;;  %4642 = vmatprep.subr.bf16.mxu0 %v5651_v60 }
 0x250   :  { %4706 = vmatprep.subr.bf16.mxu1 %v5653_v62 }
 0x252   :  { %4643 = vmatpush3.bf16.msra.mxu0 %v5652_v63 }
 0x253   :  { %4707 = vmatpush3.bf16.msra.mxu1 %v5654_v1  ;;  %4644 = vmatprep.subr.bf16.mxu0 %v5655_v3 }
 0x254   :  { %3402 = vmatmul.mubr.bf16.gmra.mrb[40].mxu0 %v6213_v38  ;;  %4708 = vmatprep.subr.bf16.mxu1 %v5657_v0 }
 0x255   :  { %3628 = vmatmul.mubr.bf16.gmra.mrb[40].mxu1 %v6213_v38  ;;  %3411 = vmatprep.mubr.bf16.mxu0 %v6227_v26  ;;  %v5665_v38 = vld [vmem:[%s6562_s5 + $0xf0] sm:$0xff]  }
 0x256   :  { %3637 = vmatprep.mubr.bf16.mxu1 %v6227_v26  ;;  %4645 = vmatpush3.bf16.msra.mxu0 %v5656_v40  ;;  %v5664_v26 = vld [vmem:[%s6562_s5 + $0x30] sm:$0xff]  }
 0x257   :  { %4709 = vmatpush3.bf16.msra.mxu1 %v5658_v4  ;;  %4646 = vmatprep.subr.bf16.mxu0 %v5659_v5 }
 0x258   :  { %4710 = vmatprep.subr.bf16.mxu1 %v5661_v6 }
 0x25a   :  { %4647 = vmatpush3.bf16.msra.mxu0 %v5660_v7 }
 0x25b   :  { %4711 = vmatpush3.bf16.msra.mxu1 %v5662_v9  ;;  %4648 = vmatprep.subr.bf16.mxu0 %v5663_v11 }
 0x25c   :  { %3412 = vmatmul.mubr.bf16.gmra.mrb[44].mxu0 %v6225_v24  ;;  %4712 = vmatprep.subr.bf16.mxu1 %v5665_v38 }
 0x25d   :  { %3638 = vmatmul.mubr.bf16.gmra.mrb[44].mxu1 %v6225_v24  ;;  %3421 = vmatprep.mubr.bf16.mxu0 %v6239_v10  ;;  %v5667_v24 = vld [vmem:[%s6562_s5 + $0x78] sm:$0xff]  }
 0x25e   :  { %3647 = vmatprep.mubr.bf16.mxu1 %v6239_v10  ;;  %4649 = vmatpush3.bf16.msra.mxu0 %v5664_v26  ;;  %v5668_v10 = vld [vmem:[%s6562_s5 + $0x38] sm:$0xff]  }
 0x25f   :  { %4713 = vmatpush3.bf16.msra.mxu1 %v5666_v12  ;;  %4650 = vmatprep.subr.bf16.mxu0 %v5667_v24 }
 0x262   :  { %4651 = vmatpush3.bf16.msra.mxu0 %v5668_v10 }
 0x264   :  { %3422 = vmatmul.mubr.bf16.gmra.mrb[48].mxu0 %v6237_v8 }
 0x265   :  { %3648 = vmatmul.mubr.bf16.gmra.mrb[48].mxu1 %v6237_v8  ;;  %3431 = vmatprep.mubr.bf16.mxu0 %v6251_v61  ;;  %v5669_v8 = vld [vmem:[%s6562_s5 + $0xf8] sm:$0xff]  }
 0x266   :  { %3657 = vmatprep.mubr.bf16.mxu1 %v6251_v61  ;;  %4714 = vmatprep.subr.bf16.mxu1 %v5669_v8  ;;  %v2574_v61 = vld [vmem:[%s6561_s4] sm:$0xf] }
 0x267   :  { %v6418_v13 = vrot.slane %v2574_v61, %v427_v52  ;;  %v6422_v14 = vrot.slane %v2574_v61, %v435_v53 }
 0x26c   :  { %3432 = vmatmul.mubr.bf16.gmra.mrb[52].mxu0 %v6249_v59 }
 0x26d   :  { %3658 = vmatmul.mubr.bf16.gmra.mrb[52].mxu1 %v6249_v59  ;;  %3441 = vmatprep.mubr.bf16.mxu0 %v6263_v43  ;;  %v5670_v59 = vld [vmem:[%s6562_s5 + $0xb8] sm:$0xff]  }
 0x26e   :  { %3667 = vmatprep.mubr.bf16.mxu1 %v6263_v43  ;;  %4715 = vmatpush3.bf16.msra.mxu1 %v5670_v59  ;;  %v6414_v43 = vrot.slane %v2574_v61, %v431_v50 }
 0x274   :  { %3442 = vmatmul.mubr.bf16.gmra.mrb[56].mxu0 %v6261_v41 }
 0x275   :  { %3668 = vmatmul.mubr.bf16.gmra.mrb[56].mxu1 %v6261_v41  ;;  %3451 = vmatprep.mubr.bf16.mxu0 %v6275_v31  ;;  %v6410_v41 = vrot.slane %v2574_v61, %v423_v49 }
 0x276   :  { %3677 = vmatprep.mubr.bf16.mxu1 %v6275_v31 }
 0x27c   :  { %3452 = vmatmul.mubr.bf16.gmra.mrb[60].mxu0 %v6273_v56 }
 0x27d   :  { %3678 = vmatmul.mubr.bf16.gmra.mrb[60].mxu1 %v6273_v56 }
 0x317   :  { %v3383_v15 = vpop.f32.mrb[32].mxu0 }
 0x318   :  { %v4828_v16 = vadd.f32 %v3383_v15, %v6410_v41  ;;  %v3609_v17 = vpop.f32.mrb[32].mxu1  ;;  %v3385_v18 = vpop.f32.mrb[33].mxu0 }
 0x319   :  { %v4860_v49 = vadd.f32 %v3609_v17, %v6414_v43  ;;  %v4829_v20 = vadd.f32 %v3385_v18, %v6418_v13  ;;  %v3611_v23 = vpop.f32.mrb[33].mxu1  ;;  %v3387_v50 = vpop.f32.mrb[34].mxu0 }
 0x31a   :  { %v4861_v25 = vadd.f32 %v3611_v23, %v6422_v14  ;;  %v4830_v52 = vadd.f32 %v3387_v50, %v6410_v41  ;;  %v3613_v54 = vpop.f32.mrb[34].mxu1  ;;  %v3389_v55 = vpop.f32.mrb[35].mxu0  ;;  %v3688_v28 = vmax.f32 %v4828_v16, 0.0 }
 0x31b   :  { %v4862_v48 = vadd.f32 %v3613_v54, %v6414_v43  ;;  %v4831_v53 = vadd.f32 %v3389_v55, %v6418_v13  ;;  %v3615_v27 = vpop.f32.mrb[35].mxu1  ;;  %v3690_v56 = vmax.f32 %v4860_v49, 0.0  ;;  %v3689_v57 = vmax.f32 %v4829_v20, 0.0 }
 0x31c   :  { %v3692_v29 = vmax.f32 %v4830_v52, 0.0  ;;  %v4863_v30 = vadd.f32 %v3615_v27, %v6422_v14  ;;  %v3691_v33 = vmax.f32 %v4861_v25, 0.0 }
 0x31d   :  { %v3694_v31 = vmax.f32 %v4862_v48, 0.0  ;;  %v3693_v32 = vmax.f32 %v4831_v53, 0.0 }
 0x31e   :  { %v3752_v34 = vpack.c.bf16 %v3692_v29, %v3688_v28  ;;  %v3695_v35 = vmax.f32 %v4863_v30, 0.0 }
 0x31f   :  { %v3754_v36 = vpack.c.bf16 %v3694_v31, %v3690_v56  ;;  %v3753_v37 = vpack.c.bf16 %v3693_v32, %v3689_v57  ;;  %v3393_v22 = vpop.f32.mrb[36].mxu0 }
 0x320   :  { %v3755_v39 = vpack.c.bf16 %v3695_v35, %v3691_v33  ;;  %v4832_v42 = vadd.f32 %v3393_v22, %v6410_v41  ;;  %v3619_v21 = vpop.f32.mrb[36].mxu1  ;;  %v3395_v44 = vpop.f32.mrb[37].mxu0 }
 0x321   :  { %v4864_v45 = vadd.f32 %v3619_v21, %v6414_v43  ;;  %v4833_v46 = vadd.f32 %v3395_v44, %v6418_v13  ;;  %v3621_v47 = vpop.f32.mrb[37].mxu1  ;;  %v3397_v51 = vpop.f32.mrb[38].mxu0  ;;  %4079 = vmatprep.mubr.bf16.mxu0 %v3753_v37 }
 0x322   :  { %v4865_v19 = vadd.f32 %v3621_v47, %v6422_v14  ;;  %v4834_v2 = vadd.f32 %v3397_v51, %v6410_v41  ;;  %v3623_v58 = vpop.f32.mrb[38].mxu1  ;;  %4176 = vmatprep.mubr.bf16.mxu1 %v3755_v39  ;;  %v3399_v60 = vpop.f32.mrb[39].mxu0  ;;  %4080 = vmatmul.mubr.bf16.vlgmr.msra.gmra.mrb[64].mxu0 %v3752_v34  ;;  %v3696_v3 = vmax.f32 %v4832_v42, 0.0 }
 0x323   :  { %v4866_v62 = vadd.f32 %v3623_v58, %v6414_v43  ;;  %v4835_v63 = vadd.f32 %v3399_v60, %v6418_v13  ;;  %v3625_v1 = vpop.f32.mrb[39].mxu1  ;;  %4177 = vmatmul.mubr.bf16.vlgmr.msra.gmra.mrb[64].mxu1 %v3754_v36  ;;  %v3698_v4 = vmax.f32 %v4864_v45, 0.0  ;;  %v3697_v5 = vmax.f32 %v4833_v46, 0.0 }
 0x324   :  { %v3700_v0 = vmax.f32 %v4834_v2, 0.0  ;;  %v4867_v40 = vadd.f32 %v3625_v1, %v6422_v14  ;;  %v3699_v9 = vmax.f32 %v4865_v19, 0.0 }
 0x325   :  { %v3702_v6 = vmax.f32 %v4866_v62, 0.0  ;;  %v3701_v7 = vmax.f32 %v4835_v63, 0.0 }
 0x326   :  { %v3756_v11 = vpack.c.bf16 %v3700_v0, %v3696_v3  ;;  %v3703_v38 = vmax.f32 %v4867_v40, 0.0 }
 0x327   :  { %v3758_v26 = vpack.c.bf16 %v3702_v6, %v3698_v4  ;;  %v3757_v12 = vpack.c.bf16 %v3701_v7, %v3697_v5  ;;  %v3403_v24 = vpop.f32.mrb[40].mxu0 }
 0x328   :  { %v3759_v8 = vpack.c.bf16 %v3703_v38, %v3699_v9  ;;  %v4836_v10 = vadd.f32 %v3403_v24, %v6410_v41  ;;  %v3629_v59 = vpop.f32.mrb[40].mxu1  ;;  %v3405_v61 = vpop.f32.mrb[41].mxu0 }
 0x329   :  { %v4868_v15 = vadd.f32 %v3629_v59, %v6414_v43  ;;  %v4837_v16 = vadd.f32 %v3405_v61, %v6418_v13  ;;  %v3631_v17 = vpop.f32.mrb[41].mxu1  ;;  %v3407_v18 = vpop.f32.mrb[42].mxu0  ;;  %4087 = vmatprep.mubr.bf16.mxu0 %v3757_v12 }
 0x32a   :  { %v4869_v49 = vadd.f32 %v3631_v17, %v6422_v14  ;;  %v4838_v20 = vadd.f32 %v3407_v18, %v6410_v41  ;;  %v3633_v23 = vpop.f32.mrb[42].mxu1  ;;  %4184 = vmatprep.mubr.bf16.mxu1 %v3759_v8  ;;  %v3409_v50 = vpop.f32.mrb[43].mxu0  ;;  %4088 = vmatmul.mubr.bf16.gmra.mrb[68].mxu0 %v3756_v11  ;;  %v3704_v55 = vmax.f32 %v4836_v10, 0.0 }
 0x32b   :  { %v4870_v25 = vadd.f32 %v3633_v23, %v6414_v43  ;;  %v4839_v52 = vadd.f32 %v3409_v50, %v6418_v13  ;;  %v3635_v54 = vpop.f32.mrb[43].mxu1  ;;  %4185 = vmatmul.mubr.bf16.gmra.mrb[68].mxu1 %v3758_v26  ;;  %v3706_v27 = vmax.f32 %v4868_v15, 0.0  ;;  %v3705_v28 = vmax.f32 %v4837_v16, 0.0 }
 0x32c   :  { %v3708_v48 = vmax.f32 %v4838_v20, 0.0  ;;  %v4871_v53 = vadd.f32 %v3635_v54, %v6422_v14  ;;  %v3707_v56 = vmax.f32 %v4869_v49, 0.0 }
 0x32d   :  { %v3710_v29 = vmax.f32 %v4870_v25, 0.0  ;;  %v3709_v30 = vmax.f32 %v4839_v52, 0.0 }
 0x32e   :  { %v3760_v57 = vpack.c.bf16 %v3708_v48, %v3704_v55  ;;  %v3711_v31 = vmax.f32 %v4871_v53, 0.0 }
 0x32f   :  { %v3762_v32 = vpack.c.bf16 %v3710_v29, %v3706_v27  ;;  %v3761_v33 = vpack.c.bf16 %v3709_v30, %v3705_v28  ;;  %v3413_v34 = vpop.f32.mrb[44].mxu0 }
 0x330   :  { %v3763_v35 = vpack.c.bf16 %v3711_v31, %v3707_v56  ;;  %v4840_v36 = vadd.f32 %v3413_v34, %v6410_v41  ;;  %v3639_v37 = vpop.f32.mrb[44].mxu1  ;;  %v3415_v22 = vpop.f32.mrb[45].mxu0 }
 0x331   :  { %v4872_v39 = vadd.f32 %v3639_v37, %v6414_v43  ;;  %v4841_v42 = vadd.f32 %v3415_v22, %v6418_v13  ;;  %v3641_v21 = vpop.f32.mrb[45].mxu1  ;;  %v3417_v44 = vpop.f32.mrb[46].mxu0  ;;  %4095 = vmatprep.mubr.bf16.mxu0 %v3761_v33 }
 0x332   :  { %v4873_v45 = vadd.f32 %v3641_v21, %v6422_v14  ;;  %v4842_v46 = vadd.f32 %v3417_v44, %v6410_v41  ;;  %v3643_v47 = vpop.f32.mrb[46].mxu1  ;;  %4192 = vmatprep.mubr.bf16.mxu1 %v3763_v35  ;;  %v3419_v51 = vpop.f32.mrb[47].mxu0  ;;  %4096 = vmatmul.mubr.bf16.gmra.mrb[72].mxu0 %v3760_v57  ;;  %v3712_v60 = vmax.f32 %v4840_v36, 0.0 }
 0x333   :  { %v4874_v19 = vadd.f32 %v3643_v47, %v6414_v43  ;;  %v4843_v2 = vadd.f32 %v3419_v51, %v6418_v13  ;;  %v3645_v58 = vpop.f32.mrb[47].mxu1  ;;  %4193 = vmatmul.mubr.bf16.gmra.mrb[72].mxu1 %v3762_v32  ;;  %v3714_v1 = vmax.f32 %v4872_v39, 0.0  ;;  %v3713_v3 = vmax.f32 %v4841_v42, 0.0 }
 0x334   :  { %v3716_v62 = vmax.f32 %v4842_v46, 0.0  ;;  %v4875_v63 = vadd.f32 %v3645_v58, %v6422_v14  ;;  %v3715_v4 = vmax.f32 %v4873_v45, 0.0 }
 0x335   :  { %v3718_v0 = vmax.f32 %v4874_v19, 0.0  ;;  %v3717_v40 = vmax.f32 %v4843_v2, 0.0 }
 0x336   :  { %v3764_v5 = vpack.c.bf16 %v3716_v62, %v3712_v60  ;;  %v3719_v6 = vmax.f32 %v4875_v63, 0.0 }
 0x337   :  { %v3766_v7 = vpack.c.bf16 %v3718_v0, %v3714_v1  ;;  %v3765_v9 = vpack.c.bf16 %v3717_v40, %v3713_v3  ;;  %v3423_v11 = vpop.f32.mrb[48].mxu0 }
 0x338   :  { %v3767_v38 = vpack.c.bf16 %v3719_v6, %v3715_v4  ;;  %v4844_v26 = vadd.f32 %v3423_v11, %v6410_v41  ;;  %v3649_v12 = vpop.f32.mrb[48].mxu1  ;;  %v3425_v24 = vpop.f32.mrb[49].mxu0 }
 0x339   :  { %v4876_v8 = vadd.f32 %v3649_v12, %v6414_v43  ;;  %v4845_v10 = vadd.f32 %v3425_v24, %v6418_v13  ;;  %v3651_v59 = vpop.f32.mrb[49].mxu1  ;;  %v3427_v61 = vpop.f32.mrb[50].mxu0  ;;  %4103 = vmatprep.mubr.bf16.mxu0 %v3765_v9 }
 0x33a   :  { %v4877_v15 = vadd.f32 %v3651_v59, %v6422_v14  ;;  %v4846_v16 = vadd.f32 %v3427_v61, %v6410_v41  ;;  %v3653_v17 = vpop.f32.mrb[50].mxu1  ;;  %4200 = vmatprep.mubr.bf16.mxu1 %v3767_v38  ;;  %v3429_v18 = vpop.f32.mrb[51].mxu0  ;;  %4104 = vmatmul.mubr.bf16.gmra.mrb[76].mxu0 %v3764_v5  ;;  %v3720_v50 = vmax.f32 %v4844_v26, 0.0 }
 0x33b   :  { %v4878_v49 = vadd.f32 %v3653_v17, %v6414_v43  ;;  %v4847_v20 = vadd.f32 %v3429_v18, %v6418_v13  ;;  %v3655_v23 = vpop.f32.mrb[51].mxu1  ;;  %4201 = vmatmul.mubr.bf16.gmra.mrb[76].mxu1 %v3766_v7  ;;  %v3722_v54 = vmax.f32 %v4876_v8, 0.0  ;;  %v3721_v55 = vmax.f32 %v4845_v10, 0.0 }
 0x33c   :  { %v3724_v25 = vmax.f32 %v4846_v16, 0.0  ;;  %v4879_v52 = vadd.f32 %v3655_v23, %v6422_v14  ;;  %v3723_v27 = vmax.f32 %v4877_v15, 0.0 }
 0x33d   :  { %v3726_v48 = vmax.f32 %v4878_v49, 0.0  ;;  %v3725_v53 = vmax.f32 %v4847_v20, 0.0 }
 0x33e   :  { %v3768_v28 = vpack.c.bf16 %v3724_v25, %v3720_v50  ;;  %v3727_v29 = vmax.f32 %v4879_v52, 0.0 }
 0x33f   :  { %v3770_v30 = vpack.c.bf16 %v3726_v48, %v3722_v54  ;;  %v3769_v56 = vpack.c.bf16 %v3725_v53, %v3721_v55  ;;  %v3433_v57 = vpop.f32.mrb[52].mxu0 }
 0x340   :  { %v3771_v31 = vpack.c.bf16 %v3727_v29, %v3723_v27  ;;  %v4848_v32 = vadd.f32 %v3433_v57, %v6410_v41  ;;  %v3659_v33 = vpop.f32.mrb[52].mxu1  ;;  %v3435_v34 = vpop.f32.mrb[53].mxu0 }
 0x341   :  { %v4880_v35 = vadd.f32 %v3659_v33, %v6414_v43  ;;  %v4849_v36 = vadd.f32 %v3435_v34, %v6418_v13  ;;  %v3661_v37 = vpop.f32.mrb[53].mxu1  ;;  %v3437_v22 = vpop.f32.mrb[54].mxu0  ;;  %4111 = vmatprep.mubr.bf16.mxu0 %v3769_v56 }
 0x342   :  { %v4881_v39 = vadd.f32 %v3661_v37, %v6422_v14  ;;  %v4850_v42 = vadd.f32 %v3437_v22, %v6410_v41  ;;  %v3663_v21 = vpop.f32.mrb[54].mxu1  ;;  %4208 = vmatprep.mubr.bf16.mxu1 %v3771_v31  ;;  %v3439_v44 = vpop.f32.mrb[55].mxu0  ;;  %4112 = vmatmul.mubr.bf16.gmra.mrb[80].mxu0 %v3768_v28  ;;  %v3728_v51 = vmax.f32 %v4848_v32, 0.0 }
 0x343   :  { %v4882_v45 = vadd.f32 %v3663_v21, %v6414_v43  ;;  %v4851_v46 = vadd.f32 %v3439_v44, %v6418_v13  ;;  %v3665_v47 = vpop.f32.mrb[55].mxu1  ;;  %4209 = vmatmul.mubr.bf16.gmra.mrb[80].mxu1 %v3770_v30  ;;  %v3730_v58 = vmax.f32 %v4880_v35, 0.0  ;;  %v3729_v60 = vmax.f32 %v4849_v36, 0.0 }
 0x344   :  { %v3732_v19 = vmax.f32 %v4850_v42, 0.0  ;;  %v4883_v2 = vadd.f32 %v3665_v47, %v6422_v14  ;;  %v3731_v1 = vmax.f32 %v4881_v39, 0.0 }
 0x345   :  { %v3734_v62 = vmax.f32 %v4882_v45, 0.0  ;;  %v3733_v63 = vmax.f32 %v4851_v46, 0.0 }
 0x346   :  { %v3772_v3 = vpack.c.bf16 %v3732_v19, %v3728_v51  ;;  %v3735_v0 = vmax.f32 %v4883_v2, 0.0 }
 0x347   :  { %v3774_v40 = vpack.c.bf16 %v3734_v62, %v3730_v58  ;;  %v3773_v4 = vpack.c.bf16 %v3733_v63, %v3729_v60  ;;  %v3443_v5 = vpop.f32.mrb[56].mxu0 }
 0x348   :  { %v3775_v6 = vpack.c.bf16 %v3735_v0, %v3731_v1  ;;  %v4852_v7 = vadd.f32 %v3443_v5, %v6410_v41  ;;  %v3669_v9 = vpop.f32.mrb[56].mxu1  ;;  %v3445_v11 = vpop.f32.mrb[57].mxu0 }
 0x349   :  { %v4884_v38 = vadd.f32 %v3669_v9, %v6414_v43  ;;  %v4853_v26 = vadd.f32 %v3445_v11, %v6418_v13  ;;  %v3671_v12 = vpop.f32.mrb[57].mxu1  ;;  %v3447_v24 = vpop.f32.mrb[58].mxu0  ;;  %4119 = vmatprep.mubr.bf16.mxu0 %v3773_v4 }
 0x34a   :  { %v4885_v8 = vadd.f32 %v3671_v12, %v6422_v14  ;;  %v4854_v10 = vadd.f32 %v3447_v24, %v6410_v41  ;;  %v3673_v59 = vpop.f32.mrb[58].mxu1  ;;  %4216 = vmatprep.mubr.bf16.mxu1 %v3775_v6  ;;  %v3449_v61 = vpop.f32.mrb[59].mxu0  ;;  %4120 = vmatmul.mubr.bf16.gmra.mrb[84].mxu0 %v3772_v3  ;;  %v3736_v18 = vmax.f32 %v4852_v7, 0.0 }
 0x34b   :  { %v4886_v15 = vadd.f32 %v3673_v59, %v6414_v43  ;;  %v4855_v16 = vadd.f32 %v3449_v61, %v6418_v13  ;;  %v3675_v17 = vpop.f32.mrb[59].mxu1  ;;  %4217 = vmatmul.mubr.bf16.gmra.mrb[84].mxu1 %v3774_v40  ;;  %v3738_v23 = vmax.f32 %v4884_v38, 0.0  ;;  %v3737_v50 = vmax.f32 %v4853_v26, 0.0 }
 0x34c   :  { %v3740_v49 = vmax.f32 %v4854_v10, 0.0  ;;  %v4887_v20 = vadd.f32 %v3675_v17, %v6422_v14  ;;  %v3739_v54 = vmax.f32 %v4885_v8, 0.0 }
 0x34d   :  { %v3742_v25 = vmax.f32 %v4886_v15, 0.0  ;;  %v3741_v52 = vmax.f32 %v4855_v16, 0.0 }
 0x34e   :  { %v3776_v55 = vpack.c.bf16 %v3740_v49, %v3736_v18  ;;  %v3743_v48 = vmax.f32 %v4887_v20, 0.0 }
 0x34f   :  { %v3778_v53 = vpack.c.bf16 %v3742_v25, %v3738_v23  ;;  %v3777_v27 = vpack.c.bf16 %v3741_v52, %v3737_v50  ;;  %v3453_v28 = vpop.f32.mrb[60].mxu0 }
 0x350   :  { %v3779_v29 = vpack.c.bf16 %v3743_v48, %v3739_v54  ;;  %v4856_v30 = vadd.f32 %v3453_v28, %v6410_v41  ;;  %v3679_v56 = vpop.f32.mrb[60].mxu1  ;;  %v3455_v57 = vpop.f32.mrb[61].mxu0 }
 0x351   :  { %v4888_v31 = vadd.f32 %v3679_v56, %v6414_v43  ;;  %v4857_v32 = vadd.f32 %v3455_v57, %v6418_v13  ;;  %v3681_v33 = vpop.f32.mrb[61].mxu1  ;;  %v3457_v34 = vpop.f32.mrb[62].mxu0  ;;  %4127 = vmatprep.mubr.bf16.mxu0 %v3777_v27 }
 0x352   :  { %v4889_v35 = vadd.f32 %v3681_v33, %v6422_v14  ;;  %v4858_v36 = vadd.f32 %v3457_v34, %v6410_v41  ;;  %v3683_v37 = vpop.f32.mrb[62].mxu1  ;;  %4224 = vmatprep.mubr.bf16.mxu1 %v3779_v29  ;;  %v3459_v22 = vpop.f32.mrb[63].mxu0  ;;  %4128 = vmatmul.mubr.bf16.gmra.mrb[88].mxu0 %v3776_v55  ;;  %v3744_v44 = vmax.f32 %v4856_v30, 0.0 }
 0x353   :  { %v4890_v39 = vadd.f32 %v3683_v37, %v6414_v43  ;;  %v4859_v42 = vadd.f32 %v3459_v22, %v6418_v13  ;;  %v3685_v21 = vpop.f32.mrb[63].mxu1  ;;  %4225 = vmatmul.mubr.bf16.gmra.mrb[88].mxu1 %v3778_v53  ;;  %v3746_v47 = vmax.f32 %v4888_v31, 0.0  ;;  %v3745_v51 = vmax.f32 %v4857_v32, 0.0 }
 0x354   :  { %v3748_v45 = vmax.f32 %v4858_v36, 0.0  ;;  %v4891_v46 = vadd.f32 %v3685_v21, %v6422_v14  ;;  %v3747_v58 = vmax.f32 %v4889_v35, 0.0  ;;  %v6491_v14 = vld [vmem:[%s6563_s6] ss:$0 sm:$0xff] }
 0x355   :  { %v3750_v19 = vmax.f32 %v4890_v39, 0.0  ;;  %v3749_v2 = vmax.f32 %v4859_v42, 0.0 }
 0x356   :  { %v3780_v41 = vpack.c.bf16 %v3748_v45, %v3744_v44  ;;  %v3751_v60 = vmax.f32 %v4891_v46, 0.0 }
 0x357   :  { %v3782_v62 = vpack.c.bf16 %v3750_v19, %v3746_v47  ;;  %v3781_v63 = vpack.c.bf16 %v3749_v2, %v3745_v51 }
 0x358   :  { %v3783_v1 = vpack.c.bf16 %v3751_v60, %v3747_v58 }
 0x359   :  { %4135 = vmatprep.mubr.bf16.mxu0 %v3781_v63 }
 0x35a   :  { %4232 = vmatprep.mubr.bf16.mxu1 %v3783_v1  ;;  %4136 = vmatmul.mubr.bf16.gmra.mrb[92].mxu0 %v3780_v41 }
 0x35b   :  { %4233 = vmatmul.mubr.bf16.gmra.mrb[92].mxu1 %v3782_v62 }
 0x3f5   :  { %v4652_v43 = vpop.f32.mrb[64].mxu0 }
 0x3f6   :  { %v4716_v13 = vpop.f32.mrb[64].mxu1  ;;  %v4653_v3 = vpop.f32.mrb[65].mxu0 }
 0x3f7   :  { %v4654_v0 = vadd.f32 %v4653_v3, %v4652_v43  ;;  %v4717_v40 = vpop.f32.mrb[65].mxu1  ;;  %v4655_v4 = vpop.f32.mrb[66].mxu0 }
 0x3f8   :  { %v4718_v5 = vadd.f32 %v4717_v40, %v4716_v13  ;;  %v4719_v6 = vpop.f32.mrb[66].mxu1  ;;  %v4656_v7 = vpop.f32.mrb[67].mxu0 }
 0x3f9   :  { %v4082_v9 = vadd.f32 %v4654_v0, %v6491_v14  ;;  %v4657_v11 = vadd.f32 %v4656_v7, %v4655_v4  ;;  %v4720_v38 = vpop.f32.mrb[67].mxu1 }
 0x3fa   :  { %v4721_v26 = vadd.f32 %v4720_v38, %v4719_v6 }
 0x3fb   :  { %v4179_v12 = vadd.f32 %v4718_v5, %v4082_v9  ;;  %v4085_v24 = vadd.f32 %v4657_v11, %v6491_v14 }
 0x3fd   :  { %4241 = vst [vmem:[%s6564_s7] sm:$0xff] %v4179_v12  ;;  %v4182_v8 = vadd.f32 %v4721_v26, %v4085_v24  ;;  %v4658_v10 = vpop.f32.mrb[68].mxu0 }
 0x3fe   :  { %v4722_v59 = vpop.f32.mrb[68].mxu1  ;;  %v4659_v61 = vpop.f32.mrb[69].mxu0 }
 0x3ff   :  { %4242 = vst [vmem:[%s6564_s7 + $0x8] sm:$0xff] %v4182_v8  ;;  %v4660_v15 = vadd.f32 %v4659_v61, %v4658_v10  ;;  %v4723_v16 = vpop.f32.mrb[69].mxu1  ;;  %v4661_v17 = vpop.f32.mrb[70].mxu0 }
 0x400   :  { %v4724_v18 = vadd.f32 %v4723_v16, %v4722_v59  ;;  %v4725_v49 = vpop.f32.mrb[70].mxu1  ;;  %v4662_v20 = vpop.f32.mrb[71].mxu0 }
 0x401   :  { %v4090_v23 = vadd.f32 %v4660_v15, %v6491_v14  ;;  %v4663_v50 = vadd.f32 %v4662_v20, %v4661_v17  ;;  %v4726_v25 = vpop.f32.mrb[71].mxu1 }
 0x402   :  { %v4727_v52 = vadd.f32 %v4726_v25, %v4725_v49 }
 0x403   :  { %v4187_v54 = vadd.f32 %v4724_v18, %v4090_v23  ;;  %v4093_v55 = vadd.f32 %v4663_v50, %v6491_v14 }
 0x405   :  { %4243 = vst [vmem:[%s6564_s7 + $0x10] sm:$0xff] %v4187_v54  ;;  %v4190_v48 = vadd.f32 %v4727_v52, %v4093_v55  ;;  %v4664_v53 = vpop.f32.mrb[72].mxu0 }
 0x406   :  { %v4728_v27 = vpop.f32.mrb[72].mxu1  ;;  %v4665_v28 = vpop.f32.mrb[73].mxu0 }
 0x407   :  { %4244 = vst [vmem:[%s6564_s7 + $0x18] sm:$0xff] %v4190_v48  ;;  %v4666_v29 = vadd.f32 %v4665_v28, %v4664_v53  ;;  %v4729_v30 = vpop.f32.mrb[73].mxu1  ;;  %v4667_v56 = vpop.f32.mrb[74].mxu0 }
 0x408   :  { %v4730_v57 = vadd.f32 %v4729_v30, %v4728_v27  ;;  %v4731_v31 = vpop.f32.mrb[74].mxu1  ;;  %v4668_v32 = vpop.f32.mrb[75].mxu0 }
 0x409   :  { %v4098_v33 = vadd.f32 %v4666_v29, %v6491_v14  ;;  %v4669_v34 = vadd.f32 %v4668_v32, %v4667_v56  ;;  %v4732_v35 = vpop.f32.mrb[75].mxu1 }
 0x40a   :  { %v4733_v36 = vadd.f32 %v4732_v35, %v4731_v31 }
 0x40b   :  { %v4195_v37 = vadd.f32 %v4730_v57, %v4098_v33  ;;  %v4101_v22 = vadd.f32 %v4669_v34, %v6491_v14 }
 0x40d   :  { %4245 = vst [vmem:[%s6564_s7 + $0x20] sm:$0xff] %v4195_v37  ;;  %v4198_v39 = vadd.f32 %v4733_v36, %v4101_v22  ;;  %v4670_v42 = vpop.f32.mrb[76].mxu0 }
 0x40e   :  { %v4734_v21 = vpop.f32.mrb[76].mxu1  ;;  %v4671_v44 = vpop.f32.mrb[77].mxu0 }
 0x40f   :  { %4246 = vst [vmem:[%s6564_s7 + $0x28] sm:$0xff] %v4198_v39  ;;  %v4672_v45 = vadd.f32 %v4671_v44, %v4670_v42  ;;  %v4735_v46 = vpop.f32.mrb[77].mxu1  ;;  %v4673_v47 = vpop.f32.mrb[78].mxu0 }
 0x410   :  { %v4736_v51 = vadd.f32 %v4735_v46, %v4734_v21  ;;  %v4737_v19 = vpop.f32.mrb[78].mxu1  ;;  %v4674_v2 = vpop.f32.mrb[79].mxu0 }
 0x411   :  { %v4106_v58 = vadd.f32 %v4672_v45, %v6491_v14  ;;  %v4675_v41 = vadd.f32 %v4674_v2, %v4673_v47  ;;  %v4738_v60 = vpop.f32.mrb[79].mxu1 }
 0x412   :  { %v4739_v62 = vadd.f32 %v4738_v60, %v4737_v19 }
 0x413   :  { %v4203_v63 = vadd.f32 %v4736_v51, %v4106_v58  ;;  %v4109_v1 = vadd.f32 %v4675_v41, %v6491_v14 }
 0x415   :  { %4247 = vst [vmem:[%s6564_s7 + $0x30] sm:$0xff] %v4203_v63  ;;  %v4206_v43 = vadd.f32 %v4739_v62, %v4109_v1  ;;  %v4676_v13 = vpop.f32.mrb[80].mxu0 }
 0x416   :  { %v4740_v3 = vpop.f32.mrb[80].mxu1  ;;  %v4677_v0 = vpop.f32.mrb[81].mxu0 }
 0x417   :  { %4248 = vst [vmem:[%s6564_s7 + $0x38] sm:$0xff] %v4206_v43  ;;  %v4678_v40 = vadd.f32 %v4677_v0, %v4676_v13  ;;  %v4741_v4 = vpop.f32.mrb[81].mxu1  ;;  %v4679_v5 = vpop.f32.mrb[82].mxu0 }
 0x418   :  { %v4742_v6 = vadd.f32 %v4741_v4, %v4740_v3  ;;  %v4743_v7 = vpop.f32.mrb[82].mxu1  ;;  %v4680_v9 = vpop.f32.mrb[83].mxu0 }
 0x419   :  { %v4114_v11 = vadd.f32 %v4678_v40, %v6491_v14  ;;  %v4681_v38 = vadd.f32 %v4680_v9, %v4679_v5  ;;  %v4744_v26 = vpop.f32.mrb[83].mxu1 }
 0x41a   :  { %v4745_v12 = vadd.f32 %v4744_v26, %v4743_v7 }
 0x41b   :  { %v4211_v24 = vadd.f32 %v4742_v6, %v4114_v11  ;;  %v4117_v8 = vadd.f32 %v4681_v38, %v6491_v14 }
 0x41d   :  { %4249 = vst [vmem:[%s6564_s7 + $0x40] sm:$0xff] %v4211_v24  ;;  %v4214_v10 = vadd.f32 %v4745_v12, %v4117_v8  ;;  %v4682_v59 = vpop.f32.mrb[84].mxu0 }
 0x41e   :  { %v4746_v61 = vpop.f32.mrb[84].mxu1  ;;  %v4683_v15 = vpop.f32.mrb[85].mxu0 }
 0x41f   :  { %4250 = vst [vmem:[%s6564_s7 + $0x48] sm:$0xff] %v4214_v10  ;;  %v4684_v16 = vadd.f32 %v4683_v15, %v4682_v59  ;;  %v4747_v17 = vpop.f32.mrb[85].mxu1  ;;  %v4685_v18 = vpop.f32.mrb[86].mxu0 }
 0x420   :  { %v4748_v49 = vadd.f32 %v4747_v17, %v4746_v61  ;;  %v4749_v20 = vpop.f32.mrb[86].mxu1  ;;  %v4686_v23 = vpop.f32.mrb[87].mxu0 }
 0x421   :  { %v4122_v50 = vadd.f32 %v4684_v16, %v6491_v14  ;;  %v4687_v25 = vadd.f32 %v4686_v23, %v4685_v18  ;;  %v4750_v52 = vpop.f32.mrb[87].mxu1 }
 0x422   :  { %v4751_v54 = vadd.f32 %v4750_v52, %v4749_v20 }
 0x423   :  { %v4219_v55 = vadd.f32 %v4748_v49, %v4122_v50  ;;  %v4125_v48 = vadd.f32 %v4687_v25, %v6491_v14 }
 0x425   :  { %4251 = vst [vmem:[%s6564_s7 + $0x50] sm:$0xff] %v4219_v55  ;;  %v4222_v53 = vadd.f32 %v4751_v54, %v4125_v48  ;;  %v4688_v27 = vpop.f32.mrb[88].mxu0 }
 0x426   :  { %v4752_v28 = vpop.f32.mrb[88].mxu1  ;;  %v4689_v29 = vpop.f32.mrb[89].mxu0 }
 0x427   :  { %4252 = vst [vmem:[%s6564_s7 + $0x58] sm:$0xff] %v4222_v53  ;;  %v4690_v30 = vadd.f32 %v4689_v29, %v4688_v27  ;;  %v4753_v56 = vpop.f32.mrb[89].mxu1  ;;  %v4691_v57 = vpop.f32.mrb[90].mxu0 }
 0x428   :  { %v4754_v31 = vadd.f32 %v4753_v56, %v4752_v28  ;;  %v4755_v32 = vpop.f32.mrb[90].mxu1  ;;  %v4692_v33 = vpop.f32.mrb[91].mxu0 }
 0x429   :  { %v4130_v34 = vadd.f32 %v4690_v30, %v6491_v14  ;;  %v4693_v35 = vadd.f32 %v4692_v33, %v4691_v57  ;;  %v4756_v36 = vpop.f32.mrb[91].mxu1 }
 0x42a   :  { %v4757_v37 = vadd.f32 %v4756_v36, %v4755_v32 }
 0x42b   :  { %v4227_v22 = vadd.f32 %v4754_v31, %v4130_v34  ;;  %v4133_v39 = vadd.f32 %v4693_v35, %v6491_v14 }
 0x42d   :  { %4253 = vst [vmem:[%s6564_s7 + $0x60] sm:$0xff] %v4227_v22  ;;  %v4230_v42 = vadd.f32 %v4757_v37, %v4133_v39  ;;  %v4694_v21 = vpop.f32.mrb[92].mxu0 }
 0x42e   :  { %v4758_v44 = vpop.f32.mrb[92].mxu1  ;;  %v4695_v45 = vpop.f32.mrb[93].mxu0 }
 0x42f   :  { %4254 = vst [vmem:[%s6564_s7 + $0x68] sm:$0xff] %v4230_v42  ;;  %v4696_v46 = vadd.f32 %v4695_v45, %v4694_v21  ;;  %v4759_v47 = vpop.f32.mrb[93].mxu1  ;;  %v4697_v51 = vpop.f32.mrb[94].mxu0 }
 0x430   :  { %v4760_v19 = vadd.f32 %v4759_v47, %v4758_v44  ;;  %v4761_v2 = vpop.f32.mrb[94].mxu1  ;;  %v4698_v58 = vpop.f32.mrb[95].mxu0 }
 0x431   :  { %v4138_v41 = vadd.f32 %v4696_v46, %v6491_v14  ;;  %v4699_v60 = vadd.f32 %v4698_v58, %v4697_v51  ;;  %v4762_v62 = vpop.f32.mrb[95].mxu1 }
 0x432   :  { %v4763_v63 = vadd.f32 %v4762_v62, %v4761_v2 }
 0x433   :  { %v4235_v1 = vadd.f32 %v4760_v19, %v4138_v41  ;;  %v4141_v43 = vadd.f32 %v4699_v60, %v6491_v14 }
 0x435   :  { %4255 = vst [vmem:[%s6564_s7 + $0x70] sm:$0xff] %v4235_v1  ;;  %v4238_v13 = vadd.f32 %v4763_v63, %v4141_v43 }
 0x437   :  { %4256 = vst [vmem:[%s6564_s7 + $0x78] sm:$0xff] %v4238_v13 }
 0x438   :  { %4261 = vsyncpa [#allocation3], 1 }
 0x439   :  { %4262 = vsyncpa [#allocation5], 1 }

</bundles_post_ra>
